<compile_context>
chip_gen: v5e
topology: v5e:2x2
jax: 0.10.0
libtpu: 0.0.40
codegen_flags: <defaults>
</compile_context>

<pallas_src>
import jax
import jax.numpy as jnp
from jax.experimental import pallas as pl
from jax.experimental.pallas import tpu as pltpu

RADIUS_OF_INFLUENCE = 0.6
NEG_SLOPE = 0.2  # PyG GATv2Conv default leaky_relu slope


# ----------------------------- Pallas kernel ---------------------------------
def hl_dgn_kernel(xf_ref, adj_ref, pw_ref,
                  w1_ref, w2_ref, wlr_ref,
                  bias_h_ref, blr_ref, bg_ref,
                  att_ref, vmask_ref, hmask_ref,
                  wo_ref, bo_ref,
                  out_ref):
    xf = xf_ref[0]                      # (M, Fin)   node features of block_b graphs
    adjf = adj_ref[0]                   # (G, N, N)  per-graph adjacency (edge j -> i), 0/1 float
    pw = pw_ref[0]                      # (G, N)     dm-mask / N pooling weights

    G, N, _ = adjf.shape
    heads, CE = vmask_ref.shape         # CE = C + heads (denominator ones lanes appended)
    C = hmask_ref.shape[1]              # heads * hidden
    H = C // heads
    M = xf.shape[0]

    b1 = bias_h_ref[0:1, :]
    b2 = bias_h_ref[1:2, :]

    # ---- dense layers, batched over all block_b*N rows (good MXU row utilization) ----
    h = jnp.maximum(jnp.dot(xf, w1_ref[...], preferred_element_type=jnp.float32) + b1, 0.0)
    h = jnp.maximum(jnp.dot(h, w2_ref[...], preferred_element_type=jnp.float32) + b2, 0.0)

    # fused lin_l | lin_r: a single lane-dense (H, 2C) matmul, then split halves
    xlr = jnp.dot(h, wlr_ref[...], preferred_element_type=jnp.float32) + blr_ref[...]  # (M, 2C)
    xl = xlr[:, :C]                     # sources (lin_l)
    xr = xlr[:, C:]                     # targets (lin_r)

    # value operand with `heads` trailing ones lanes -> softmax denominators for free on the MXU
    xle = jnp.concatenate([xl, jnp.ones((M, heads), jnp.float32)], axis=-1)            # (M, CE)

    xl3 = xl.reshape(G, N, C)
    xr3 = xr.reshape(G, N, C)
    xle3 = xle.reshape(G, N, CE)

    # ---- per-graph (diagonal-block) GATv2 attention: scores only where edges can exist ----
    s = xr3[:, :, None, :] + xl3[:, None, :, :]          # (G, N, N, C): s[g,i,j] = xr[i] + xl[j]
    s = jnp.where(s > 0, s, NEG_SLOPE * s)               # leaky_relu
    sa = s * att_ref[...].reshape(1, 1, 1, C)            # single packed att multiply (all heads)

    adj_ok = adjf > 0.0
    neg = jnp.float32(-1e30)

    o_acc = jnp.zeros((G, N, CE), jnp.float32)           # un-normalized head slab + denominators
    for hd in range(heads):                              # heads is static -> unrolled
        e = jnp.sum(sa[..., hd * H:(hd + 1) * H], axis=-1)   # (G,N,N) per-head partial lane reduce
        e = jnp.where(adj_ok, e, neg)
        m = jnp.max(e, axis=-1, keepdims=True)
        p = jnp.exp(e - m) * adjf                            # masked entries exactly zero
        v = xle3 * vmask_ref[hd:hd + 1, :]                   # this head's lanes + its ones lane
        o_acc = o_acc + jnp.einsum('gij,gjc->gic', p, v,
                                   preferred_element_type=jnp.float32)

    # deferred softmax normalization; per-head denominators sit in lanes [C, C+heads)
    inv_slab = jnp.zeros((G, N, C), jnp.float32)
    for hd in range(heads):
        d = o_acc[..., C + hd:C + hd + 1]                    # (G, N, 1)
        r = pl.reciprocal(jnp.maximum(d, jnp.float32(1e-30)), approx=True)
        r = r * (2.0 - d * r)                                # one Newton step -> ~f32 accuracy
        inv_slab = inv_slab + r * hmask_ref[hd:hd + 1, :]

    o = jnp.maximum(o_acc[..., :C] * inv_slab + bg_ref[...], 0.0)   # GATv2 bias + F.relu
    pooled = jnp.sum(o * pw[:, :, None], axis=1)             # (G, C): dm-mask * global_mean_pool
    out = jnp.dot(pooled, wo_ref[...], preferred_element_type=jnp.float32) + bo_ref[...]
    out_ref[0] = out                                          # (G, 128) lane-dense padded store


# ------------------------------- wrapper --------------------------------------
def hl_dgn_forward(x, adj, dm, params, block_b=None):
    B, N, Fin = x.shape
    H = params["w1"].shape[1]
    heads = params["att"].shape[0]
    C = heads * H
    CE = C + heads
    Dout = params["wo"].shape[1]
    DPAD = 128                           # lane-dense output head; real Dout sliced off below

    if block_b is None:
        # >= 2 grid steps so v7x can shard the "parallel" batch axis across both TensorCores
        block_b = B // 2 if (B >= 2 and B % 2 == 0) else B
    assert B % block_b == 0, "batch must be divisible by block_b"
    nb = B // block_b
    M = block_b * N

    # ---------- wrapper-side (XLA) layout prep: per-graph, no block-diagonal blowup ----------
    xf3 = x.reshape(nb, M, Fin).astype(jnp.float32)
    adj4 = adj.reshape(nb, block_b, N, N).astype(jnp.float32)
    # TODO(synk): ship adj as int8/bool to further cut HBM traffic once agents_num/batch grows.
    assert dm.shape == (B, N, 1), "per-node dm_mask expected (trailing channel dim must be 1)"
    pw3 = dm.reshape(nb, block_b, N).astype(jnp.float32) / jnp.float32(N)

    w1 = params["w1"].astype(jnp.float32)
    w2 = params["w2"].astype(jnp.float32)
    wlr = jnp.concatenate([params["wl"], params["wr"]], axis=1).astype(jnp.float32)     # (H, 2C)
    blr = jnp.concatenate([params["bl"], params["br"]], axis=1).astype(jnp.float32)     # (1, 2C)
    bias_h = jnp.concatenate([params["b1"], params["b2"]], axis=0).astype(jnp.float32)  # (2, H)
    bg = params["bg"].astype(jnp.float32)                                               # (1, C)

    att_all = params["att"].reshape(1, C).astype(jnp.float32)           # [att_h0 | att_h1 | ...]
    hmask = jnp.repeat(jnp.eye(heads, dtype=jnp.float32), H, axis=1)    # (heads, C) lane masks
    vmask = jnp.concatenate([hmask, jnp.eye(heads, dtype=jnp.float32)], axis=1)  # (heads, CE)

    wo_pad = jnp.zeros((C, DPAD), jnp.float32).at[:, :Dout].set(params["wo"].astype(jnp.float32))
    bo_pad = jnp.zeros((1, DPAD), jnp.float32).at[:, :Dout].set(params["bo"].astype(jnp.float32))

    def blk3(g):
        return (g, 0, 0)

    def blk4(g):
        return (g, 0, 0, 0)

    def const2(g):
        return (0, 0)

    in_specs = [
        pl.BlockSpec((1, M, Fin), blk3),             # xf3
        pl.BlockSpec((1, block_b, N, N), blk4),      # adj4
        pl.BlockSpec((1, block_b, N), blk3),         # pw3
        pl.BlockSpec((Fin, H), const2),              # w1
        pl.BlockSpec((H, H), const2),                # w2
        pl.BlockSpec((H, 2 * C), const2),            # wlr (lin_l | lin_r fused)
        pl.BlockSpec((2, H), const2),                # bias_h (b1, b2)
        pl.BlockSpec((1, 2 * C), const2),            # blr (bl | br)
        pl.BlockSpec((1, C), const2),                # bg
        pl.BlockSpec((1, C), const2),                # att_all
        pl.BlockSpec((heads, CE), const2),           # vmask (head lanes + denom ones lane)
        pl.BlockSpec((heads, C), const2),            # hmask
        pl.BlockSpec((C, DPAD), const2),             # wo (padded)
        pl.BlockSpec((1, DPAD), const2),             # bo (padded)
    ]
    out_specs = pl.BlockSpec((1, block_b, DPAD), blk3)

    # explicit VMEM budget derived from the actual per-step working set (v7x has 64 MiB physical)
    wt_bytes = 4 * int(w1.size + w2.size + wlr.size + bias_h.size + blr.size + bg.size
                       + att_all.size + vmask.size + hmask.size + wo_pad.size + bo_pad.size)
    s_bytes = 4 * block_b * N * N * C
    blk_bytes = 4 * (M * Fin + block_b * N * N + block_b * N + block_b * DPAD)
    vmem_limit = int(min(64 << 20,
                         max(16 << 20, 8 * s_bytes + 4 * blk_bytes + 2 * wt_bytes + (2 << 20))))

    flops = int(2 * B * N * (Fin * H + H * H + H * 2 * C)
                + B * N * N * (4 * C + heads * (4 + 2 * CE))
                + 2 * B * N * C + 2 * B * C * DPAD)
    ce = pl.CostEstimate(
        flops=flops,
        transcendentals=int(B * N * N * heads + B * N * heads),
        bytes_accessed=int(4 * (x.size + adj4.size + pw3.size + B * DPAD) + nb * wt_bytes))

    out = pl.pallas_call(
        hl_dgn_kernel,
        out_shape=jax.ShapeDtypeStruct((nb, block_b, DPAD), jnp.float32),
        grid=(nb,),
        in_specs=in_specs,
        out_specs=out_specs,
        compiler_params=pltpu.CompilerParams(
            dimension_semantics=("parallel",),
            vmem_limit_bytes=vmem_limit),
        cost_estimate=ce,
    )(xf3, adj4, pw3, w1, w2, wlr, bias_h, blr, bg, att_all, vmask, hmask, wo_pad, bo_pad)

    return out.reshape(B, DPAD)[:, :Dout]


# --------------------------- pure-JAX reference --------------------------------
def ref_forward(x, adj, dm, params):
    B, N, Fin = x.shape
    H = params["w1"].shape[1]
    heads = params["att"].shape[0]

    h = jax.nn.relu(x @ params["w1"] + params["b1"])
    h = h @ params["w2"] + params["b2"]
    h = jax.nn.relu(h)                                   # (B, N, H)

    xl = h @ params["wl"] + params["bl"]                 # (B, N, heads*H)
    xr = h @ params["wr"] + params["br"]
    xl = xl.reshape(B, N, heads, H)
    xr = xr.reshape(B, N, heads, H)

    s = xr[:, :, None, :, :] + xl[:, None, :, :, :]      # (B, i, j, heads, H)
    s = jax.nn.leaky_relu(s, NEG_SLOPE)
    e = jnp.einsum("bijhc,hc->bijh", s, params["att"])   # (B, N, N, heads)
    e = jnp.where(adj[:, :, :, None] > 0, e, -1e30)
    m = jnp.max(e, axis=2, keepdims=True)
    p = jnp.exp(e - m) * adj[:, :, :, None]
    alpha = p / jnp.sum(p, axis=2, keepdims=True)
    o = jnp.einsum("bijh,bjhc->bihc", alpha, xl)         # (B, N, heads, H)
    o = o.reshape(B, N, heads * H) + params["bg"]
    o = jax.nn.relu(o)
    o = o * dm                                           # (B, N, heads*H)
    pooled = jnp.mean(o, axis=1)                         # global_mean_pool
    return pooled @ params["wo"] + params["bo"]


# ----------------------------------- main --------------------------------------
if __name__ == "__main__":
    # small shapes consistent with the module
    B, N, Fin, H, HEADS, Dout = 8, 8, 6, 32, 2, 5
    BLOCK_B = 4          # 4 graphs per grid step -> grid=(2,), "parallel" lets v7x use both TCs

    key = jax.random.PRNGKey(0)
    ks = jax.random.split(key, 20)

    def init(k, shape, scale=0.1):
        return (scale * jax.random.normal(k, shape)).astype(jnp.float32)

    params = {
        # encoder MLP
        "w1": init(ks[0], (Fin, H)), "b1": init(ks[1], (1, H)),
        "w2": init(ks[2], (H, H)),   "b2": init(ks[3], (1, H)),
        # GATv2Conv (lin_l / lin_r / att / bias)
        "wl": init(ks[4], (H, HEADS * H)), "bl": init(ks[5], (1, HEADS * H)),
        "wr": init(ks[6], (H, HEADS * H)), "br": init(ks[7], (1, HEADS * H)),
        "att": init(ks[8], (HEADS, H)),
        "bg": init(ks[9], (1, HEADS * H)),
        # out_linear (no dueling)
        "wo": init(ks[10], (HEADS * H, Dout)), "bo": init(ks[11], (1, Dout)),
    }

    # obs: [B, agents_num, input_dim]; first 2 features are 2-D positions in [0,1]
    obs = jax.random.uniform(ks[12], (B, N, Fin), dtype=jnp.float32)

    # TODO(synk): build_pyg_batch_time internals are not provided; approximated here in plain-JAX
    # glue as a dense radius graph (+ self loops, matching GATv2 add_self_loops=True) and a
    # synthetic per-node dm_mask.
    pos = obs[..., :2]
    d2 = jnp.sum((pos[:, :, None, :] - pos[:, None, :, :]) ** 2, axis=-1)   # (B, N, N)
    adj = (d2 <= RADIUS_OF_INFLUENCE ** 2).astype(jnp.float32)              # includes diagonal
    dm_mask = (jax.random.uniform(ks[13], (B, N, 1)) > 0.3).astype(jnp.float32)

    out = hl_dgn_forward(obs, adj, dm_mask, params, block_b=BLOCK_B)
    out = jax.block_until_ready(out)

    ref = ref_forward(obs, adj, dm_mask, params)
    assert out.shape == (B, Dout)
    # MXU f32 default precision (bf16-split) + differing accumulation order vs XLA reference;
    # use lax.Precision.HIGHEST on the dots if exact parity is ever required.
    assert jnp.allclose(out, ref, atol=1e-3, rtol=1e-2), (out, ref)

    print("KERNEL_OK")
</pallas_src>

<mosaic_0001>
module attributes {stable_mosaic.version = 11 : i64} {
  func.func @hl_dgn_kernel(%arg0: i32, %arg1: memref<1x32x6xf32, #tpu.memory_space<vmem>>, %arg2: memref<1x4x8x8xf32, #tpu.memory_space<vmem>>, %arg3: memref<1x4x8xf32, #tpu.memory_space<vmem>>, %arg4: memref<6x32xf32, #tpu.memory_space<vmem>>, %arg5: memref<32x32xf32, #tpu.memory_space<vmem>>, %arg6: memref<32x128xf32, #tpu.memory_space<vmem>>, %arg7: memref<2x32xf32, #tpu.memory_space<vmem>>, %arg8: memref<1x128xf32, #tpu.memory_space<vmem>>, %arg9: memref<1x64xf32, #tpu.memory_space<vmem>>, %arg10: memref<1x64xf32, #tpu.memory_space<vmem>>, %arg11: memref<2x66xf32, #tpu.memory_space<vmem>>, %arg12: memref<2x64xf32, #tpu.memory_space<vmem>>, %arg13: memref<64x128xf32, #tpu.memory_space<vmem>>, %arg14: memref<1x128xf32, #tpu.memory_space<vmem>>, %arg15: memref<1x4x128xf32, #tpu.memory_space<vmem>>) attributes {dimension_semantics = [#tpu.dimension_semantics<parallel>], iteration_bounds = array<i64: 2>, scalar_prefetch = 0 : i64, scratch_operands = 0 : i64, tpu.core_type = #tpu.core_type<tc>, window_params = [{transform_indices = @transform_0, window_bounds = array<i64: 1, 32, 6>}, {transform_indices = @transform_1, window_bounds = array<i64: 1, 4, 8, 8>}, {transform_indices = @transform_2, window_bounds = array<i64: 1, 4, 8>}, {pipeline_mode = #tpu.pipeline_mode<synchronous>, transform_indices = @transform_3, window_bounds = array<i64: 6, 32>}, {pipeline_mode = #tpu.pipeline_mode<synchronous>, transform_indices = @transform_4, window_bounds = array<i64: 32, 32>}, {pipeline_mode = #tpu.pipeline_mode<synchronous>, transform_indices = @transform_5, window_bounds = array<i64: 32, 128>}, {pipeline_mode = #tpu.pipeline_mode<synchronous>, transform_indices = @transform_6, window_bounds = array<i64: 2, 32>}, {pipeline_mode = #tpu.pipeline_mode<synchronous>, transform_indices = @transform_7, window_bounds = array<i64: 1, 128>}, {pipeline_mode = #tpu.pipeline_mode<synchronous>, transform_indices = @transform_8, window_bounds = array<i64: 1, 64>}, {pipeline_mode = #tpu.pipeline_mode<synchronous>, transform_indices = @transform_9, window_bounds = array<i64: 1, 64>}, {pipeline_mode = #tpu.pipeline_mode<synchronous>, transform_indices = @transform_10, window_bounds = array<i64: 2, 66>}, {pipeline_mode = #tpu.pipeline_mode<synchronous>, transform_indices = @transform_11, window_bounds = array<i64: 2, 64>}, {pipeline_mode = #tpu.pipeline_mode<synchronous>, transform_indices = @transform_12, window_bounds = array<i64: 64, 128>}, {pipeline_mode = #tpu.pipeline_mode<synchronous>, transform_indices = @transform_13, window_bounds = array<i64: 1, 128>}, {transform_indices = @transform_14, window_bounds = array<i64: 1, 4, 128>}]} {
    %c0 = arith.constant 0 : index
    %c0_0 = arith.constant 0 : index
    %c0_1 = arith.constant 0 : index
    %0 = vector.load %arg1[%c0, %c0_0, %c0_1] : memref<1x32x6xf32, #tpu.memory_space<vmem>>, vector<1x32x6xf32>
    %1 = vector.shape_cast %0 : vector<1x32x6xf32> to vector<32x6xf32>
    %c0_2 = arith.constant 0 : index
    %c0_3 = arith.constant 0 : index
    %c0_4 = arith.constant 0 : index
    %c0_5 = arith.constant 0 : index
    %2 = vector.load %arg2[%c0_2, %c0_3, %c0_4, %c0_5] : memref<1x4x8x8xf32, #tpu.memory_space<vmem>>, vector<1x4x8x8xf32>
    %3 = vector.shape_cast %2 : vector<1x4x8x8xf32> to vector<4x8x8xf32>
    %c0_6 = arith.constant 0 : index
    %c0_7 = arith.constant 0 : index
    %c0_8 = arith.constant 0 : index
    %4 = vector.load %arg3[%c0_6, %c0_7, %c0_8] : memref<1x4x8xf32, #tpu.memory_space<vmem>>, vector<1x4x8xf32>
    %5 = vector.shape_cast %4 : vector<1x4x8xf32> to vector<4x8xf32>
    %c0_9 = arith.constant 0 : index
    %c0_10 = arith.constant 0 : index
    %6 = vector.load %arg7[%c0_9, %c0_10] : memref<2x32xf32, #tpu.memory_space<vmem>>, vector<1x32xf32>
    %c1 = arith.constant 1 : index
    %c0_11 = arith.constant 0 : index
    %7 = vector.load %arg7[%c1, %c0_11] : memref<2x32xf32, #tpu.memory_space<vmem>>, vector<1x32xf32>
    %c0_12 = arith.constant 0 : index
    %c0_13 = arith.constant 0 : index
    %8 = vector.load %arg4[%c0_12, %c0_13] : memref<6x32xf32, #tpu.memory_space<vmem>>, vector<6x32xf32>
    %cst = arith.constant dense<0.000000e+00> : vector<32x32xf32>
    %9 = tpu.matmul %1, %8, %cst {dimension_numbers = #tpu.dot_dimension_numbers<[1], [0], [0], [1], [0, 0, 1, 1], [], []>} : vector<32x6xf32>, vector<6x32xf32>, vector<32x32xf32> -> vector<32x32xf32>
    %10 = vector.broadcast %6 : vector<1x32xf32> to vector<32x32xf32>
    %11 = arith.addf %9, %10 : vector<32x32xf32>
    %cst_14 = arith.constant 0.000000e+00 : f32
    %12 = vector.broadcast %cst_14 : f32 to vector<32x32xf32>
    %13 = arith.maximumf %11, %12 : vector<32x32xf32>
    %c0_15 = arith.constant 0 : index
    %c0_16 = arith.constant 0 : index
    %14 = vector.load %arg5[%c0_15, %c0_16] : memref<32x32xf32, #tpu.memory_space<vmem>>, vector<32x32xf32>
    %cst_17 = arith.constant dense<0.000000e+00> : vector<32x32xf32>
    %15 = tpu.matmul %13, %14, %cst_17 {dimension_numbers = #tpu.dot_dimension_numbers<[1], [0], [0], [1], [0, 0, 1, 1], [], []>} : vector<32x32xf32>, vector<32x32xf32>, vector<32x32xf32> -> vector<32x32xf32>
    %16 = vector.broadcast %7 : vector<1x32xf32> to vector<32x32xf32>
    %17 = arith.addf %15, %16 : vector<32x32xf32>
    %cst_18 = arith.constant 0.000000e+00 : f32
    %18 = vector.broadcast %cst_18 : f32 to vector<32x32xf32>
    %19 = arith.maximumf %17, %18 : vector<32x32xf32>
    %c0_19 = arith.constant 0 : index
    %c0_20 = arith.constant 0 : index
    %20 = vector.load %arg6[%c0_19, %c0_20] : memref<32x128xf32, #tpu.memory_space<vmem>>, vector<32x128xf32>
    %cst_21 = arith.constant dense<0.000000e+00> : vector<32x128xf32>
    %21 = tpu.matmul %19, %20, %cst_21 {dimension_numbers = #tpu.dot_dimension_numbers<[1], [0], [0], [1], [0, 0, 1, 1], [], []>} : vector<32x32xf32>, vector<32x128xf32>, vector<32x128xf32> -> vector<32x128xf32>
    %c0_22 = arith.constant 0 : index
    %c0_23 = arith.constant 0 : index
    %22 = vector.load %arg8[%c0_22, %c0_23] : memref<1x128xf32, #tpu.memory_space<vmem>>, vector<1x128xf32>
    %23 = vector.broadcast %22 : vector<1x128xf32> to vector<32x128xf32>
    %24 = arith.addf %21, %23 : vector<32x128xf32>
    %25 = vector.extract_strided_slice %24 {offsets = [0, 0], sizes = [32, 64], strides = [1, 1]} : vector<32x128xf32> to vector<32x64xf32>
    %26 = vector.extract_strided_slice %24 {offsets = [0, 64], sizes = [32, 64], strides = [1, 1]} : vector<32x128xf32> to vector<32x64xf32>
    %cst_24 = arith.constant 1.000000e+00 : f32
    %27 = vector.broadcast %cst_24 : f32 to vector<32x2xf32>
    %28 = tpu.concatenate %25, %27 in 1 : vector<32x64xf32>, vector<32x2xf32> -> vector<32x66xf32>
    %29 = vector.shape_cast %25 : vector<32x64xf32> to vector<4x8x64xf32>
    %30 = vector.shape_cast %26 : vector<32x64xf32> to vector<4x8x64xf32>
    %31 = vector.shape_cast %28 : vector<32x66xf32> to vector<4x8x66xf32>
    %32 = vector.shape_cast %30 : vector<4x8x64xf32> to vector<4x8x1x64xf32>
    %33 = vector.shape_cast %29 : vector<4x8x64xf32> to vector<4x1x8x64xf32>
    %34 = vector.broadcast %32 : vector<4x8x1x64xf32> to vector<4x8x8x64xf32>
    %35 = vector.broadcast %33 : vector<4x1x8x64xf32> to vector<4x8x8x64xf32>
    %36 = arith.addf %34, %35 : vector<4x8x8x64xf32>
    %cst_25 = arith.constant 0.000000e+00 : f32
    %37 = vector.broadcast %cst_25 : f32 to vector<4x8x8x64xf32>
    %38 = arith.cmpf ogt, %36, %37 : vector<4x8x8x64xf32>
    %cst_26 = arith.constant 2.000000e-01 : f32
    %39 = vector.broadcast %cst_26 : f32 to vector<4x8x8x64xf32>
    %40 = arith.mulf %39, %36 : vector<4x8x8x64xf32>
    %41 = arith.select %38, %36, %40 : vector<4x8x8x64xi1>, vector<4x8x8x64xf32>
    %c0_27 = arith.constant 0 : index
    %c0_28 = arith.constant 0 : index
    %42 = vector.load %arg10[%c0_27, %c0_28] : memref<1x64xf32, #tpu.memory_space<vmem>>, vector<1x64xf32>
    %43 = vector.shape_cast %42 : vector<1x64xf32> to vector<1x1x1x64xf32>
    %44 = vector.broadcast %43 : vector<1x1x1x64xf32> to vector<4x8x8x64xf32>
    %45 = arith.mulf %41, %44 : vector<4x8x8x64xf32>
    %cst_29 = arith.constant 0.000000e+00 : f32
    %46 = vector.broadcast %cst_29 : f32 to vector<4x8x8xf32>
    %47 = arith.cmpf ogt, %3, %46 : vector<4x8x8xf32>
    %cst_30 = arith.constant 0.000000e+00 : f32
    %48 = vector.broadcast %cst_30 : f32 to vector<4x8x66xf32>
    %49 = vector.extract_strided_slice %45 {offsets = [0, 0, 0, 0], sizes = [4, 8, 8, 32], strides = [1, 1, 1, 1]} : vector<4x8x8x64xf32> to vector<4x8x8x32xf32>
    %cst_31 = arith.constant dense<0.000000e+00> : vector<4x8x8xf32>
    %50 = vector.multi_reduction <add>, %49, %cst_31 [3] : vector<4x8x8x32xf32> to vector<4x8x8xf32>
    %cst_32 = arith.constant -1.000000e+30 : f32
    %51 = vector.broadcast %cst_32 : f32 to vector<4x8x8xf32>
    %52 = arith.select %47, %50, %51 : vector<4x8x8xi1>, vector<4x8x8xf32>
    %cst_33 = arith.constant dense<0xFF800000> : vector<4x8xf32>
    %53 = vector.multi_reduction <maximumf>, %52, %cst_33 [2] : vector<4x8x8xf32> to vector<4x8xf32>
    %54 = vector.shape_cast %53 : vector<4x8xf32> to vector<4x8x1xf32>
    %55 = vector.broadcast %54 : vector<4x8x1xf32> to vector<4x8x8xf32>
    %56 = arith.subf %52, %55 : vector<4x8x8xf32>
    %57 = math.exp %56 : vector<4x8x8xf32>
    %58 = arith.mulf %57, %3 : vector<4x8x8xf32>
    %c0_34 = arith.constant 0 : index
    %c0_35 = arith.constant 0 : index
    %59 = vector.load %arg11[%c0_34, %c0_35] : memref<2x66xf32, #tpu.memory_space<vmem>>, vector<1x66xf32>
    %60 = vector.shape_cast %59 : vector<1x66xf32> to vector<1x1x66xf32>
    %61 = vector.broadcast %60 : vector<1x1x66xf32> to vector<4x8x66xf32>
    %62 = arith.mulf %31, %61 : vector<4x8x66xf32>
    "tpu.trace_start"() <{level = 10 : i32, message = "gij,gjc->gic"}> : () -> ()
    %cst_36 = arith.constant dense<0.000000e+00> : vector<4x8x66xf32>
    %63 = tpu.matmul %58, %62, %cst_36 {dimension_numbers = #tpu.dot_dimension_numbers<[2], [1], [1], [2], [0, 0, 0, 1, 1, 2], [0], [0]>} : vector<4x8x8xf32>, vector<4x8x66xf32>, vector<4x8x66xf32> -> vector<4x8x66xf32>
    "tpu.trace_stop"() : () -> ()
    %64 = arith.addf %48, %63 : vector<4x8x66xf32>
    %65 = vector.extract_strided_slice %45 {offsets = [0, 0, 0, 32], sizes = [4, 8, 8, 32], strides = [1, 1, 1, 1]} : vector<4x8x8x64xf32> to vector<4x8x8x32xf32>
    %cst_37 = arith.constant dense<0.000000e+00> : vector<4x8x8xf32>
    %66 = vector.multi_reduction <add>, %65, %cst_37 [3] : vector<4x8x8x32xf32> to vector<4x8x8xf32>
    %cst_38 = arith.constant -1.000000e+30 : f32
    %67 = vector.broadcast %cst_38 : f32 to vector<4x8x8xf32>
    %68 = arith.select %47, %66, %67 : vector<4x8x8xi1>, vector<4x8x8xf32>
    %cst_39 = arith.constant dense<0xFF800000> : vector<4x8xf32>
    %69 = vector.multi_reduction <maximumf>, %68, %cst_39 [2] : vector<4x8x8xf32> to vector<4x8xf32>
    %70 = vector.shape_cast %69 : vector<4x8xf32> to vector<4x8x1xf32>
    %71 = vector.broadcast %70 : vector<4x8x1xf32> to vector<4x8x8xf32>
    %72 = arith.subf %68, %71 : vector<4x8x8xf32>
    %73 = math.exp %72 : vector<4x8x8xf32>
    %74 = arith.mulf %73, %3 : vector<4x8x8xf32>
    %c1_40 = arith.constant 1 : index
    %c0_41 = arith.constant 0 : index
    %75 = vector.load %arg11[%c1_40, %c0_41] : memref<2x66xf32, #tpu.memory_space<vmem>>, vector<1x66xf32>
    %76 = vector.shape_cast %75 : vector<1x66xf32> to vector<1x1x66xf32>
    %77 = vector.broadcast %76 : vector<1x1x66xf32> to vector<4x8x66xf32>
    %78 = arith.mulf %31, %77 : vector<4x8x66xf32>
    "tpu.trace_start"() <{level = 10 : i32, message = "gij,gjc->gic"}> : () -> ()
    %cst_42 = arith.constant dense<0.000000e+00> : vector<4x8x66xf32>
    %79 = tpu.matmul %74, %78, %cst_42 {dimension_numbers = #tpu.dot_dimension_numbers<[2], [1], [1], [2], [0, 0, 0, 1, 1, 2], [0], [0]>} : vector<4x8x8xf32>, vector<4x8x66xf32>, vector<4x8x66xf32> -> vector<4x8x66xf32>
    "tpu.trace_stop"() : () -> ()
    %80 = arith.addf %64, %79 : vector<4x8x66xf32>
    %cst_43 = arith.constant 0.000000e+00 : f32
    %81 = vector.broadcast %cst_43 : f32 to vector<4x8x64xf32>
    %82 = vector.extract_strided_slice %80 {offsets = [0, 0, 64], sizes = [4, 8, 1], strides = [1, 1, 1]} : vector<4x8x66xf32> to vector<4x8x1xf32>
    %cst_44 = arith.constant 1.000000e-30 : f32
    %83 = vector.broadcast %cst_44 : f32 to vector<4x8x1xf32>
    %84 = arith.maximumf %82, %83 : vector<4x8x1xf32>
    %85 = tpu.reciprocal %84 {approx = true} : vector<4x8x1xf32> -> vector<4x8x1xf32>
    %86 = arith.mulf %82, %85 : vector<4x8x1xf32>
    %cst_45 = arith.constant 2.000000e+00 : f32
    %87 = vector.broadcast %cst_45 : f32 to vector<4x8x1xf32>
    %88 = arith.subf %87, %86 : vector<4x8x1xf32>
    %89 = arith.mulf %85, %88 : vector<4x8x1xf32>
    %c0_46 = arith.constant 0 : index
    %c0_47 = arith.constant 0 : index
    %90 = vector.load %arg12[%c0_46, %c0_47] : memref<2x64xf32, #tpu.memory_space<vmem>>, vector<1x64xf32>
    %91 = vector.shape_cast %90 : vector<1x64xf32> to vector<1x1x64xf32>
    %92 = vector.broadcast %89 : vector<4x8x1xf32> to vector<4x8x64xf32>
    %93 = vector.broadcast %91 : vector<1x1x64xf32> to vector<4x8x64xf32>
    %94 = arith.mulf %92, %93 : vector<4x8x64xf32>
    %95 = arith.addf %81, %94 : vector<4x8x64xf32>
    %96 = vector.extract_strided_slice %80 {offsets = [0, 0, 65], sizes = [4, 8, 1], strides = [1, 1, 1]} : vector<4x8x66xf32> to vector<4x8x1xf32>
    %cst_48 = arith.constant 1.000000e-30 : f32
    %97 = vector.broadcast %cst_48 : f32 to vector<4x8x1xf32>
    %98 = arith.maximumf %96, %97 : vector<4x8x1xf32>
    %99 = tpu.reciprocal %98 {approx = true} : vector<4x8x1xf32> -> vector<4x8x1xf32>
    %100 = arith.mulf %96, %99 : vector<4x8x1xf32>
    %cst_49 = arith.constant 2.000000e+00 : f32
    %101 = vector.broadcast %cst_49 : f32 to vector<4x8x1xf32>
    %102 = arith.subf %101, %100 : vector<4x8x1xf32>
    %103 = arith.mulf %99, %102 : vector<4x8x1xf32>
    %c1_50 = arith.constant 1 : index
    %c0_51 = arith.constant 0 : index
    %104 = vector.load %arg12[%c1_50, %c0_51] : memref<2x64xf32, #tpu.memory_space<vmem>>, vector<1x64xf32>
    %105 = vector.shape_cast %104 : vector<1x64xf32> to vector<1x1x64xf32>
    %106 = vector.broadcast %103 : vector<4x8x1xf32> to vector<4x8x64xf32>
    %107 = vector.broadcast %105 : vector<1x1x64xf32> to vector<4x8x64xf32>
    %108 = arith.mulf %106, %107 : vector<4x8x64xf32>
    %109 = arith.addf %95, %108 : vector<4x8x64xf32>
    %110 = vector.extract_strided_slice %80 {offsets = [0, 0, 0], sizes = [4, 8, 64], strides = [1, 1, 1]} : vector<4x8x66xf32> to vector<4x8x64xf32>
    %111 = arith.mulf %110, %109 : vector<4x8x64xf32>
    %c0_52 = arith.constant 0 : index
    %c0_53 = arith.constant 0 : index
    %112 = vector.load %arg9[%c0_52, %c0_53] : memref<1x64xf32, #tpu.memory_space<vmem>>, vector<1x64xf32>
    %113 = vector.shape_cast %112 : vector<1x64xf32> to vector<1x1x64xf32>
    %114 = vector.broadcast %113 : vector<1x1x64xf32> to vector<4x8x64xf32>
    %115 = arith.addf %111, %114 : vector<4x8x64xf32>
    %cst_54 = arith.constant 0.000000e+00 : f32
    %116 = vector.broadcast %cst_54 : f32 to vector<4x8x64xf32>
    %117 = arith.maximumf %115, %116 : vector<4x8x64xf32>
    %118 = vector.shape_cast %5 : vector<4x8xf32> to vector<4x8x1xf32>
    %119 = vector.broadcast %118 : vector<4x8x1xf32> to vector<4x8x64xf32>
    %120 = arith.mulf %117, %119 : vector<4x8x64xf32>
    %cst_55 = arith.constant dense<0.000000e+00> : vector<4x64xf32>
    %121 = vector.multi_reduction <add>, %120, %cst_55 [1] : vector<4x8x64xf32> to vector<4x64xf32>
    %c0_56 = arith.constant 0 : index
    %c0_57 = arith.constant 0 : index
    %122 = vector.load %arg13[%c0_56, %c0_57] : memref<64x128xf32, #tpu.memory_space<vmem>>, vector<64x128xf32>
    %cst_58 = arith.constant dense<0.000000e+00> : vector<4x128xf32>
    %123 = tpu.matmul %121, %122, %cst_58 {dimension_numbers = #tpu.dot_dimension_numbers<[1], [0], [0], [1], [0, 0, 1, 1], [], []>} : vector<4x64xf32>, vector<64x128xf32>, vector<4x128xf32> -> vector<4x128xf32>
    %c0_59 = arith.constant 0 : index
    %c0_60 = arith.constant 0 : index
    %124 = vector.load %arg14[%c0_59, %c0_60] : memref<1x128xf32, #tpu.memory_space<vmem>>, vector<1x128xf32>
    %125 = vector.broadcast %124 : vector<1x128xf32> to vector<4x128xf32>
    %126 = arith.addf %123, %125 : vector<4x128xf32>
    %c0_61 = arith.constant 0 : index
    %c0_62 = arith.constant 0 : index
    %c0_63 = arith.constant 0 : index
    %127 = vector.load %arg15[%c0_61, %c0_62, %c0_63] : memref<1x4x128xf32, #tpu.memory_space<vmem>>, vector<1x4x128xf32>
    %128 = vector.shape_cast %127 : vector<1x4x128xf32> to vector<4x128xf32>
    %129 = vector.shape_cast %126 : vector<4x128xf32> to vector<1x4x128xf32>
    tpu.vector_store %arg15[%c0_61, %c0_62, %c0_63], %129 {strides = array<i32>} : memref<1x4x128xf32, #tpu.memory_space<vmem>>, vector<1x4x128xf32>,
    return
  }
  func.func @transform_0(%arg0: i32) -> (i32, i32, i32) {
    %c0_i32 = arith.constant 0 : i32
    %c0_i32_0 = arith.constant 0 : i32
    %c0_i32_1 = arith.constant 0 : i32
    return %arg0, %c0_i32, %c0_i32_0 : i32, i32, i32
  }
  func.func @transform_1(%arg0: i32) -> (i32, i32, i32, i32) {
    %c0_i32 = arith.constant 0 : i32
    %c0_i32_0 = arith.constant 0 : i32
    %c0_i32_1 = arith.constant 0 : i32
    %c0_i32_2 = arith.constant 0 : i32
    return %arg0, %c0_i32, %c0_i32_0, %c0_i32_1 : i32, i32, i32, i32
  }
  func.func @transform_2(%arg0: i32) -> (i32, i32, i32) {
    %c0_i32 = arith.constant 0 : i32
    %c0_i32_0 = arith.constant 0 : i32
    %c0_i32_1 = arith.constant 0 : i32
    return %arg0, %c0_i32, %c0_i32_0 : i32, i32, i32
  }
  func.func @transform_3(%arg0: i32) -> (i32, i32) {
    %c0_i32 = arith.constant 0 : i32
    %c0_i32_0 = arith.constant 0 : i32
    %c0_i32_1 = arith.constant 0 : i32
    return %c0_i32, %c0_i32_0 : i32, i32
  }
  func.func @transform_4(%arg0: i32) -> (i32, i32) {
    %c0_i32 = arith.constant 0 : i32
    %c0_i32_0 = arith.constant 0 : i32
    %c0_i32_1 = arith.constant 0 : i32
    return %c0_i32, %c0_i32_0 : i32, i32
  }
  func.func @transform_5(%arg0: i32) -> (i32, i32) {
    %c0_i32 = arith.constant 0 : i32
    %c0_i32_0 = arith.constant 0 : i32
    %c0_i32_1 = arith.constant 0 : i32
    return %c0_i32, %c0_i32_0 : i32, i32
  }
  func.func @transform_6(%arg0: i32) -> (i32, i32) {
    %c0_i32 = arith.constant 0 : i32
    %c0_i32_0 = arith.constant 0 : i32
    %c0_i32_1 = arith.constant 0 : i32
    return %c0_i32, %c0_i32_0 : i32, i32
  }
  func.func @transform_7(%arg0: i32) -> (i32, i32) {
    %c0_i32 = arith.constant 0 : i32
    %c0_i32_0 = arith.constant 0 : i32
    %c0_i32_1 = arith.constant 0 : i32
    return %c0_i32, %c0_i32_0 : i32, i32
  }
  func.func @transform_8(%arg0: i32) -> (i32, i32) {
    %c0_i32 = arith.constant 0 : i32
    %c0_i32_0 = arith.constant 0 : i32
    %c0_i32_1 = arith.constant 0 : i32
    return %c0_i32, %c0_i32_0 : i32, i32
  }
  func.func @transform_9(%arg0: i32) -> (i32, i32) {
    %c0_i32 = arith.constant 0 : i32
    %c0_i32_0 = arith.constant 0 : i32
    %c0_i32_1 = arith.constant 0 : i32
    return %c0_i32, %c0_i32_0 : i32, i32
  }
  func.func @transform_10(%arg0: i32) -> (i32, i32) {
    %c0_i32 = arith.constant 0 : i32
    %c0_i32_0 = arith.constant 0 : i32
    %c0_i32_1 = arith.constant 0 : i32
    return %c0_i32, %c0_i32_0 : i32, i32
  }
  func.func @transform_11(%arg0: i32) -> (i32, i32) {
    %c0_i32 = arith.constant 0 : i32
    %c0_i32_0 = arith.constant 0 : i32
    %c0_i32_1 = arith.constant 0 : i32
    return %c0_i32, %c0_i32_0 : i32, i32
  }
  func.func @transform_12(%arg0: i32) -> (i32, i32) {
    %c0_i32 = arith.constant 0 : i32
    %c0_i32_0 = arith.constant 0 : i32
    %c0_i32_1 = arith.constant 0 : i32
    return %c0_i32, %c0_i32_0 : i32, i32
  }
  func.func @transform_13(%arg0: i32) -> (i32, i32) {
    %c0_i32 = arith.constant 0 : i32
    %c0_i32_0 = arith.constant 0 : i32
    %c0_i32_1 = arith.constant 0 : i32
    return %c0_i32, %c0_i32_0 : i32, i32
  }
  func.func @transform_14(%arg0: i32) -> (i32, i32, i32) {
    %c0_i32 = arith.constant 0 : i32
    %c0_i32_0 = arith.constant 0 : i32
    %c0_i32_1 = arith.constant 0 : i32
    return %arg0, %c0_i32, %c0_i32_0 : i32, i32, i32
  }
}

</mosaic_0001>

<bundles_post_ra>
// kernel: tpu_custom_call.1
= control target key start
LH: loop header
LB: loop body
LE: loop exit
PB: predicated region body
PF: predicated region fallthrough
CT: control target
= control target key end

     0   :  { %s3600_s0 = inlined_call_operand.vmem [shape: f32[2,32,6], index: 0, kind: input, shape index: {}]   ;;  %s3601_s1 = inlined_call_operand.vmem [shape: f32[2,4,8,8], index: 1, kind: input, shape index: {}]   ;;  %s3602_s2 = inlined_call_operand.vmem [shape: f32[2,4,8], index: 2, kind: input, shape index: {}]   ;;  %s3603_s3 = inlined_call_operand.hbm [shape: f32[6,32], index: 3, kind: input, shape index: {}]   ;;  %s3604_s4 = inlined_call_operand.hbm [shape: f32[32,32], index: 4, kind: input, shape index: {}]   ;;  %s3605_s5 = inlined_call_operand.hbm [shape: f32[32,128], index: 5, kind: input, shape index: {}]   ;;  %s3606_s6 = inlined_call_operand.vmem [shape: f32[2,32], index: 6, kind: input, shape index: {}]   ;;  %s3607_s7 = inlined_call_operand.vmem [shape: f32[1,128], index: 7, kind: input, shape index: {}]   ;;  %s3608_s8 = inlined_call_operand.vmem [shape: f32[1,64], index: 8, kind: input, shape index: {}]   ;;  %s3609_s9 = inlined_call_operand.vmem [shape: f32[1,64], index: 9, kind: input, shape index: {}]   ;;  %s3610_s10 = inlined_call_operand.vmem [shape: f32[2,66], index: 10, kind: input, shape index: {}]   ;;  %s3611_s11 = inlined_call_operand.vmem [shape: f32[2,64], index: 11, kind: input, shape index: {}]   ;;  %s3612_s12 = inlined_call_operand.hbm [shape: f32[64,128], index: 12, kind: input, shape index: {}]   ;;  %s3613_s13 = inlined_call_operand.vmem [shape: f32[1,128], index: 13, kind: input, shape index: {}]   ;;  %s3614_s14 = inlined_call_operand.hbm [shape: f32[2,4,128], index: 14, kind: output, shape index: {}]  }
   0x1   :  { %3623 = sst [smem:[#allocation22_spill]] %s3603_s3 }
   0x2   :  { %3624 = sst [smem:[#allocation23_spill]] %s3604_s4 }
   0x3   :  { %3625 = sst [smem:[#allocation24_spill]] %s3613_s13 }
   0x4   :  { %19 = vsyncpa [#allocation3], 0 }
   0x5   :  { %20 = vsyncpa [#allocation6], 0 }
   0x6   :  { %21 = vsyncpa [#allocation9], 0 }
   0x7   :  { %22 = vsyncpa [#allocation4], 0 }
   0x8   :  { %24 = vsyncpa [#allocation4 + $0x1], 0  ;;  %s2686_s29 = smov 0   ;;  %s2688_s30 = smov 0  }
   0x9   :  { %s2690_s15 = smov 0   ;;  %s2692_s16 = smov 0  }
   0xa LB: > { %3626 = sst [smem:[#allocation15_spill]] %s2587_s29  ;;  %s2707_s17 = sadd.s32 4294967295, %s2599_s16   ;;  %s2599_s16 = sphi %s2692_s16, %s3644_s16   ;;  %s2595_s15 = sphi %s2690_s15, %s3646_s15   ;;  %s2591_s30 = sphi %s2688_s30, %s3648_s30   ;;  %s2587_s29 = sphi %s2686_s29, %s3647_s29  }
   0xb   : > { %3627 = sst [smem:[#allocation16_spill]] %s2595_s15  ;;  %s2226_s18 = sadd.s32 4294967294, %s2599_s16  }
   0xc   : > { %3628 = sst [smem:[#allocation17_spill]] %s2599_s16  ;;  %s2711_s19 = sadd.s32 1, %s2599_s16  }
   0xd   : > { %3629 = sst [smem:[#allocation18_spill]] %s2711_s19  ;;  %s346_s20 = sadd.s32 1, %s2595_s15 }
   0xe   : > { %s343_s21 = ssub.s32 %s2599_s16, %s2711_s19  ;;  %p356_p0 = scmp.ne.s32.totalorder %s2595_s15, %s2591_s30 }
   0xf   : > { %p344_p1 = scmp.eq.s32.totalorder %s343_s21, 0  ;;  %p357_p2 = scmp.eq.s32.totalorder %s2707_s17, 1 }
  0x10   : > { %p362_p3 = scmp.ne.s32.totalorder %s2591_s30, %s2587_s29  ;;  %p363_p4 = scmp.eq.s32.totalorder %s2226_s18, 1 }
  0x11   : > { %s2722_s22 = scalar_select %p344_p1, %s2595_s15, %s346_s20  }
  0x12   : > { %p2724_p5 = por %p357_p2, %p356_p0  ;;  %p2728_p6 = por %p363_p4, %p362_p3 }
  0x13   : > { %3630 = sst [smem:[#allocation19_spill]] %s2722_s22  ;;  %p2227_p7 = scmp.ge.s32.totalorder %s2599_s16, 1 }
  0x14   : > { %s3631_s23 = scalar_select %p2724_p5, 1, 0 }
  0x15   : > { %s3633_s24 = scalar_select %p2728_p6, 1, 0 }
  0x16   : > { %3632 = sst [smem:[#allocation20_spill]] %s3631_s23  ;;  %p370_p8 = scmp.lt.s32.totalorder %s2599_s16, 3 }
  0x17   : > { %3634 = sst [smem:[#allocation21_spill]] %s3633_s24  ;;  %p2308_p9 = scmp.eq.s32.totalorder %s2707_s17, 0 }
  0x18   : > { %p2735_p10 = pnand %p2227_p7, %p370_p8  ;;  %s3636_s4 = sld [smem:[#allocation23_spill]] }
  0x19   : > { %s2601_s18 = smov [#allocation5]   ;;  %s3638_s3 = sld [smem:[#allocation22_spill]] }
  0x1a   : > { %p2291_p11 = pneg %p2735_p10  ;;  %s395_s20 = sshll.u32 %s2601_s18, 4  ;;  %s396_s20 = int_to_ptr.vmem [resolvable:$true] %s395_s20 }
  0x1b   : > { %s2602_s26 = smov 128   ;;  %s2603_s27 = smov 8  }
  0x1c   : > { %p2746_p12 = pnand %p2308_p9, %p2291_p11  ;;  %s2604_s18 = smov [#allocation2]  }
  0x1d   : > { %s407_s16 = sshll.u32 %s3605_s5, 4  ;;  %s2605_s13 = smov [#allocation7]   ;;  %s408_s16 = int_to_ptr.hbm [resolvable:$true] %s407_s16 }
  0x1e   : > { %s393_s28 = sshll.u32 %s3636_s4, 4  ;;  %s384_s4 = sshll.u32 %s2604_s18, 4  ;;  %s394_s28 = int_to_ptr.hbm [resolvable:$true] %s393_s28  ;;  %s385_s4 = int_to_ptr.vmem [resolvable:$true] %s384_s4 }
  0x1f   : > { %s382_s19 = sshll.u32 %s3638_s3, 4  ;;  %s439_s3 = sshll.u32 %s3612_s12, 4  ;;  %s383_s19 = int_to_ptr.hbm [resolvable:$true] %s382_s19  ;;  %s440_s3 = int_to_ptr.hbm [resolvable:$true] %s439_s3 }
  0x20   : > { %2297 = dma.hbm_to_vmem [thread:$0]  (!%p2746_p12), %s394_s28, 512, %s396_s20, [#allocation6], %s2602_s26, %s2602_s26, %s2603_s27  }
  0x21   : > { %2294 = dma.hbm_to_vmem [thread:$0]  (!%p2746_p12), %s383_s19, 128, %s385_s4, [#allocation3]  }
  0x22   : > { %s409_s23 = sshll.u32 %s2605_s13, 4  ;;  %s2606_s28 = smov [#allocation8]   ;;  %s410_s23 = int_to_ptr.vmem [resolvable:$true] %s409_s23 }
  0x23   : > { %2300 = dma.hbm_to_vmem [thread:$0]  (!%p2746_p12), %s408_s16, 512, %s410_s23, [#allocation6], %s2602_s26, %s2602_s26, %s2603_s27  }
  0x24   : > { %s441_s20 = sshll.u32 %s2606_s28, 4  ;;  %483 = sbr.rel (%p2735_p10) target bundleno = 1634 (0x662), region = 76  ;;  %s442_s20 = int_to_ptr.vmem [resolvable:$true] %s441_s20 }
  0x25   : > { %2303 = dma.hbm_to_vmem [thread:$0]  (!%p2746_p12), %s440_s3, 1024, %s442_s20, [#allocation9], %s2602_s26, %s2602_s26, %s2603_s27  }
  0x29   : > { %2570 = dma.done.wait (%p2308_p9), [#allocation3], 128  }
  0x2a   : > { %2572 = vsyncadd (%p2308_p9), [#allocation3], 4294967168 }
  0x2b   : > { %2574 = dma.done.wait (%p2308_p9), [#allocation6], 1024  }
  0x2c   : > { %2576 = vsyncadd (%p2308_p9), [#allocation6], 4294966272 }
  0x2d   : > { %2578 = dma.done.wait (%p2308_p9), [#allocation9], 1024  }
  0x2e   : > { %2580 = vsyncadd (%p2308_p9), [#allocation9], 4294966272  ;;  %p554_p13 = scmp.lt.s32.totalorder %s2707_s17, 1  ;;  %vm594_vm0 = vcmask 1045504   ;;  %vm581_vm1 = vcmask 48128   ;;  %v634_v3 = vld [vmem:[#allocation5 + $0x18] sm:$0xff] }
  0x2f   : > { %v579_v0 = vld [vmem:[#allocation2] sm:$0x3f]  ;;  %661 = vmatpush.msra.mxu1 %v634_v3  ;;  %v633_v6 = vld [vmem:[#allocation5 + $0x10] sm:$0xff]  ;;  %v632_v7 = vld [vmem:[#allocation5 + $0x8] sm:$0xff]  ;;  %vm636_vm2 = vcmask 261120   ;;  %s2607_s27 = smov 64  }
  0x30   : > { %s2783_s3 = scalar_select %p554_p13, %s2707_s17, 1  ;;  %2244 = vmatpush.msk.msra.mxu0 %vm594_vm0, %v579_v0  ;;  %2272 = vmatpush.msk.msra.mxu3 %vm594_vm0, %v579_v0  ;;  %v631_v8 = vld [vmem:[#allocation5] sm:$0xff]  ;;  %v2369_v9 = vld [vmem:[%s3606_s6] ss:$0 sm:$0xff]  ;;  %v684_v23 = vld [vmem:[#allocation7 + $0x10] sm:$0xff]  ;;  %vm731_vm3 = vcmask 523264  }
  0x31   : > { %662 = vmatpush.msra.mxu1 %v633_v6  ;;  %v685_v10 = vld [vmem:[#allocation7 + $0x18] sm:$0xff]  ;;  %v683_v24 = vld [vmem:[#allocation7 + $0x8] sm:$0xff]  ;;  %v682_v25 = vld [vmem:[#allocation7] sm:$0xff]  ;;  %s2608_s29 = smov 32   ;;  %s3640_s18 = sld [smem:[#allocation24_spill]] }
  0x32   : > { %s2270_s4 = sshll.u32 %s2783_s3, 5  ;;  %714 = vmatpush.msra.mxu2 %v685_v10  ;;  %v2370_v26 = vld [vmem:[%s3606_s6 + $0x1] ss:$0 sm:$0xff]  ;;  %v2371_v27 = vld [vmem:[%s3609_s9] ss:$0 sm:$0xff]  ;;  %s2243_s26 = sshll.u32 %s2783_s3, 2 }
  0x33   : > { %s558_s16 = scalar_lea.vmem %s3600_s0, %s2270_s4  ;;  %663 = vmatpush.msra.mxu1 %v632_v7  ;;  %975 = vrot.lane.b32.xlu0 %v2371_v27, %s2607_s27  ;;  %v2372_v40 = vld [vmem:[%s3607_s7] ss:$0 sm:$0xff]  ;;  %v2373_v42 = vld [vmem:[%s3610_s10 + $0x1] ss:$0 sm:$0xff]  ;;  %s3312_s23 = scalar_lea.vmem %s3601_s1, %s2270_s4 }
  0x34   : > { %v568_v1 = vld [vmem:[%s558_s16] sm:$0xff]  ;;  %v571_v2 = vld [vmem:[%s558_s16 + $0x18] sm:$0xff]  ;;  %v569_v4 = vld [vmem:[%s558_s16 + $0x8] sm:$0xff]  ;;  %715 = vmatpush.msra.mxu2 %v684_v23  ;;  %s567_s15 = scalar_lea.vmem %s3602_s2, %s2243_s26 }
  0x35   : > { %2245 = vmatmul.msk.f32.vlgmr.msra.gmra.mxu0 %vm581_vm1, %v568_v1  ;;  %2248 = vmatmul.msk.f32.vlgmr.msra.gmra.mxu3 %vm581_vm1, %v571_v2  ;;  %v570_v5 = vld [vmem:[%s558_s16 + $0x10] sm:$0xff]  ;;  %v2374_v43 = vld [vmem:[%s3610_s10] ss:$0 sm:$0xff]  ;;  %s551_s16 = sand.u32 1, %s2591_s30  }
  0x36   : > { %664 = vmatpush.msra.mxu1 %v631_v8  ;;  %716 = vmatpush.msra.mxu2 %v683_v24  ;;  %s2238_s19 = sshll.u32 %s551_s16, 2  ;;  %s2087_s28 = scalar_lea.sflag [#allocation4], %s551_s16 }
  0x38   : > { %717 = vmatpush.msra.mxu2 %v682_v25 }
  0x3d   : > { %2246 = vmatmul.msk.f32.gmra.mxu0 %vm581_vm1, %v569_v4 }
  0x45   : > { %2247 = vmatmul.msk.f32.gmra.mxu0 %vm581_vm1, %v570_v5 }
  0xa5   : > { %v2847_v60 = vpop.permute.xlu0 %975 }
  0xb2   : > { %v615_v11 = vpop.f32.mrf.mxu0 }
  0xb3   : > { %v616_v12 = vadd.f32 %v2369_v9, %v615_v11 }
  0xb5   : > { %v627_v13 = vmax.f32 %v616_v12, 0.0 }
  0xb7   : > { %2249 = vmatmul.msk.f32.vlgmr.msra.gmra.mxu1 %vm636_vm2, %v627_v13 }
  0xb8   : > { %v624_v19 = vpop.f32.mrf.mxu3 }
  0xb9   : > { %v625_v21 = vadd.f32 %v2369_v9, %v624_v19 }
  0xba   : > { %v618_v14 = vpop.f32.mrf.mxu0 }
  0xbb   : > { %v619_v15 = vadd.f32 %v2369_v9, %v618_v14  ;;  %v630_v22 = vmax.f32 %v625_v21, 0.0 }
  0xbd   : > { %v628_v16 = vmax.f32 %v619_v15, 0.0 }
  0xbf   : > { %2250 = vmatmul.msk.f32.gmra.mxu1 %vm636_vm2, %v628_v16 }
  0xc2   : > { %v621_v17 = vpop.f32.mrf.mxu0 }
  0xc3   : > { %v622_v18 = vadd.f32 %v2369_v9, %v621_v17 }
  0xc5   : > { %v629_v20 = vmax.f32 %v622_v18, 0.0 }
  0xc7   : > { %2251 = vmatmul.msk.f32.gmra.mxu1 %vm636_vm2, %v629_v20 }
  0xcf   : > { %2252 = vmatmul.msk.f32.gmra.mxu1 %vm636_vm2, %v630_v22 }
 0x134   : > { %v666_v28 = vpop.f32.mrf.mxu1 }
 0x135   : > { %v667_v29 = vadd.f32 %v2370_v26, %v666_v28 }
 0x137   : > { %v678_v30 = vmax.f32 %v667_v29, 0.0 }
 0x139   : > { %2253 = vmatmul.msk.f32.vlgmr.msra.gmra.mxu2 %vm636_vm2, %v678_v30 }
 0x13c   : > { %v669_v31 = vpop.f32.mrf.mxu1 }
 0x13d   : > { %v670_v32 = vadd.f32 %v2370_v26, %v669_v31 }
 0x13f   : > { %v679_v33 = vmax.f32 %v670_v32, 0.0 }
 0x141   : > { %2254 = vmatmul.msk.f32.gmra.mxu2 %vm636_vm2, %v679_v33 }
 0x144   : > { %v672_v34 = vpop.f32.mrf.mxu1 }
 0x145   : > { %v673_v35 = vadd.f32 %v2370_v26, %v672_v34 }
 0x147   : > { %v680_v36 = vmax.f32 %v673_v35, 0.0 }
 0x149   : > { %2255 = vmatmul.msk.f32.gmra.mxu2 %vm636_vm2, %v680_v36 }
 0x14c   : > { %v675_v37 = vpop.f32.mrf.mxu1 }
 0x14d   : > { %v676_v38 = vadd.f32 %v2370_v26, %v675_v37 }
 0x14f   : > { %v681_v39 = vmax.f32 %v676_v38, 0.0 }
 0x151   : > { %2256 = vmatmul.msk.f32.gmra.mxu2 %vm636_vm2, %v681_v39 }
 0x1bc   : > { %v719_v41 = vpop.f32.mrf.mxu2 }
 0x1bd   : > { %v720_v44 = vadd.f32 %v2372_v40, %v719_v41 }
 0x1bf   : > { %832 = vrot.lane.b32.xlu0 %v720_v44, %s2607_s27  ;;  %v732_v45 = vsel %vm731_vm3, %v720_v44, 1.0  ;;  %v741_v61 = vrot.slane %v720_v44, 2  ;;  %v740_v62 = vrot.slane %v720_v44, 1  ;;  %v742_v63 = vrot.slane %v720_v44, 3 }
 0x1c0   : > { %v1704_v46 = vmul.f32 %v2373_v42, %v732_v45  ;;  %v1378_v47 = vmul.f32 %v2374_v43, %v732_v45  ;;  %v744_v0 = vrot.slane %v720_v44, 5  ;;  %v743_v1 = vrot.slane %v720_v44, 4 }
 0x1c1   : > { %v745_v2 = vrot.slane %v720_v44, 6  ;;  %v746_v3 = vrot.slane %v720_v44, 7  ;;  %v768_v6 = vperm.slane %v720_v44, 0  ;;  %v770_v7 = vperm.slane %v741_v61, 0 }
 0x1c2   : > { %1726 = vmatpush.msrb.mxu3 %v1704_v46  ;;  %1818 = vmatpush.msrb.mxu0 %v1378_v47  ;;  %v769_v9 = vperm.slane %v740_v62, 0  ;;  %v771_v10 = vperm.slane %v742_v63, 0  ;;  %v773_v11 = vperm.slane %v744_v0, 0  ;;  %v772_v13 = vperm.slane %v743_v1, 0 }
 0x1c3   : > { %v774_v14 = vperm.slane %v745_v2, 0  ;;  %v775_v15 = vperm.slane %v746_v3, 0 }
 0x1c4   : > { %v722_v48 = vpop.f32.mrf.mxu2 }
 0x1c5   : > { %v2820_v49 = vadd.f32 %v2372_v40, %v722_v48 }
 0x1c7   : > { %834 = vrot.lane.b32.xlu1 %v2820_v49, %s2607_s27  ;;  %v2826_v50 = vsel %vm731_vm3, %v2820_v49, 1.0  ;;  %v749_v4 = vrot.slane %v2820_v49, 3  ;;  %v750_v5 = vrot.slane %v2820_v49, 4  ;;  %v748_v8 = vrot.slane %v2820_v49, 2 }
 0x1c8   : > { %v1705_v51 = vmul.f32 %v2373_v42, %v2826_v50  ;;  %v753_v12 = vrot.slane %v2820_v49, 7  ;;  %v776_v16 = vperm.slane %v2820_v49, 0  ;;  %v752_v19 = vrot.slane %v2820_v49, 6 }
 0x1c9   : > { %v2854_v18 = vperm.slane %v749_v4, 0  ;;  %v780_v20 = vperm.slane %v750_v5, 0  ;;  %v751_v21 = vrot.slane %v2820_v49, 5  ;;  %v778_v25 = vperm.slane %v748_v8, 0 }
 0x1ca   : > { %1749 = vmatpush.msra.mxu3 %v1705_v51  ;;  %v2858_v28 = vperm.slane %v753_v12, 0 }
 0x1cc   : > { %v725_v52 = vpop.f32.mrf.mxu2 }
 0x1cd   : > { %v2829_v53 = vadd.f32 %v2372_v40, %v725_v52 }
 0x1cf   : > { %836 = vrot.lane.b32.xlu1 %v2829_v53, %s2607_s27  ;;  %v2835_v54 = vsel %vm731_vm3, %v2829_v53, 1.0  ;;  %v754_v29 = vrot.slane %v2829_v53, 1  ;;  %v757_v38 = vrot.slane %v2829_v53, 4  ;;  %v760_v42 = vrot.slane %v2829_v53, 7 }
 0x1d0   : > { %v1380_v55 = vmul.f32 %v2374_v43, %v2835_v54  ;;  %v755_v46 = vrot.slane %v2829_v53, 2  ;;  %v756_v61 = vrot.slane %v2829_v53, 3  ;;  %v759_v1 = vrot.slane %v2829_v53, 6 }
 0x1d1   : > { %v785_v0 = vperm.slane %v754_v29, 0  ;;  %v788_v5 = vperm.slane %v757_v38, 0 }
 0x1d2   : > { %1864 = vmatpush.msrb.mxu1 %v1380_v55  ;;  %v758_v55 = vrot.slane %v2829_v53, 5  ;;  %v786_v8 = vperm.slane %v755_v46, 0 }
 0x1d4   : > { %v728_v56 = vpop.f32.mrf.mxu2 }
 0x1d5   : > { %v2838_v57 = vadd.f32 %v2372_v40, %v728_v56  ;;  %v781_v56 = vperm.slane %v751_v21, 0 }
 0x1d7   : > { %838 = vrot.lane.b32.xlu2 %v2838_v57, %s2607_s27  ;;  %v2844_v58 = vsel %vm731_vm3, %v2838_v57, 1.0 }
 0x1d8   : > { %v1381_v59 = vmul.f32 %v2374_v43, %v2844_v58 }
 0x1da   : > { %1887 = vmatpush.msrb.mxu2 %v1381_v59  ;;  %v784_v59 = vperm.slane %v2829_v53, 0 }
 0x231   : > { %v833_v17 = vpop.permute.xlu0 %832 }
 0x232   : > { %v844_v22 = vadd.f32 %v833_v17, %v768_v6  ;;  %v846_v23 = vadd.f32 %v833_v17, %v770_v7  ;;  %v845_v24 = vadd.f32 %v833_v17, %v769_v9  ;;  %v847_v26 = vadd.f32 %v833_v17, %v771_v10 }
 0x233   : > { %v849_v27 = vadd.f32 %v833_v17, %v773_v11  ;;  %v848_v33 = vadd.f32 %v833_v17, %v772_v13  ;;  %v850_v34 = vadd.f32 %v833_v17, %v774_v14  ;;  %v851_v37 = vadd.f32 %v833_v17, %v775_v15 }
 0x234   : > { %vm876_vm4 = vcmp.gt.f32.partialorder %v844_v22, 0.0  ;;  %v908_v30 = vmul.f32 0.2, %v844_v22  ;;  %vm878_vm5 = vcmp.gt.f32.partialorder %v846_v23, 0.0  ;;  %v910_v31 = vmul.f32 0.2, %v846_v23 }
 0x235   : > { %vm877_vm6 = vcmp.gt.f32.partialorder %v845_v24, 0.0  ;;  %v909_v32 = vmul.f32 0.2, %v845_v24  ;;  %v911_v44 = vmul.f32 0.2, %v847_v26  ;;  %vm879_vm7 = vcmp.gt.f32.partialorder %v847_v26, 0.0 }
 0x236   : > { %v940_v35 = vsel %vm876_vm4, %v844_v22, %v908_v30  ;;  %v942_v36 = vsel %vm878_vm5, %v846_v23, %v910_v31  ;;  %v913_v45 = vmul.f32 0.2, %v849_v27  ;;  %vm881_vm8 = vcmp.gt.f32.partialorder %v849_v27, 0.0 }
 0x237   : > { %v2863_v39 = vmul.f32 %v2847_v60, %v940_v35  ;;  %v2866_v40 = vmul.f32 %v2847_v60, %v942_v36  ;;  %v941_v41 = vsel %vm877_vm6, %v845_v24, %v909_v32  ;;  %v912_v48 = vmul.f32 0.2, %v848_v33 }
 0x238   : > { %v2870_v43 = vmul.f32 %v2847_v60, %v941_v41  ;;  %v914_v51 = vmul.f32 0.2, %v850_v34  ;;  %vm880_vm9 = vcmp.gt.f32.partialorder %v848_v33, 0.0  ;;  %vm882_vm10 = vcmp.gt.f32.partialorder %v850_v34, 0.0 }
 0x239   : > { %v2873_v47 = vpop.permute.xlu1 %834  ;;  %1382 = vrot.lane.b32.xlu2 %v2863_v39, %s2608_s29  ;;  %1386 = vrot.lane.b32.xlu1 %v2866_v40, %s2608_s29  ;;  %v915_v52 = vmul.f32 0.2, %v851_v37  ;;  %vm883_vm11 = vcmp.gt.f32.partialorder %v851_v37, 0.0  ;;  %v943_v62 = vsel %vm879_vm7, %v847_v26, %v911_v44  ;;  %v945_v63 = vsel %vm881_vm8, %v849_v27, %v913_v45 }
 0x23a   : > { %1384 = vrot.lane.b32.xlu0 %v2870_v43, %s2608_s29  ;;  %v944_v2 = vsel %vm880_vm9, %v848_v33, %v912_v48  ;;  %v946_v3 = vsel %vm882_vm10, %v850_v34, %v914_v51  ;;  %v2886_v4 = vadd.f32 %v2873_v47, %v776_v16  ;;  %v791_v7 = vperm.slane %v760_v42, 0 }
 0x23b   : > { %v947_v6 = vsel %vm883_vm11, %v851_v37, %v915_v52  ;;  %v789_v9 = vperm.slane %v758_v55, 0  ;;  %v2889_v10 = vmul.f32 %v2847_v60, %v943_v62  ;;  %v2892_v11 = vmul.f32 %v2847_v60, %v945_v63 }
 0x23c   : > { %v856_v12 = vadd.f32 %v2873_v47, %v780_v20  ;;  %v854_v13 = vadd.f32 %v2873_v47, %v778_v25  ;;  %v2897_v14 = vmul.f32 %v2847_v60, %v944_v2  ;;  %v2900_v15 = vmul.f32 %v2847_v60, %v946_v3 }
 0x23d   : > { %v787_v16 = vperm.slane %v756_v61, 0  ;;  %v790_v17 = vperm.slane %v759_v1, 0  ;;  %v2907_v22 = vmul.f32 %v2847_v60, %v947_v6  ;;  %v916_v20 = vmul.f32 0.2, %v2886_v4 }
 0x23e   : > { %vm888_vm12 = vcmp.gt.f32.partialorder %v856_v12, 0.0  ;;  %v920_v23 = vmul.f32 0.2, %v856_v12  ;;  %vm886_vm13 = vcmp.gt.f32.partialorder %v854_v13, 0.0  ;;  %v918_v24 = vmul.f32 0.2, %v854_v13 }
 0x23f   : > { %v859_v25 = vadd.f32 %v2873_v47, %v2858_v28  ;;  %v857_v26 = vadd.f32 %v2873_v47, %v781_v56  ;;  %vm884_vm5 = vcmp.gt.f32.partialorder %v2886_v4, 0.0 }
 0x240   : > { %v952_v27 = vsel %vm888_vm12, %v856_v12, %v920_v23  ;;  %v950_v33 = vsel %vm886_vm13, %v854_v13, %v918_v24  ;;  %v948_v3 = vsel %vm884_vm5, %v2886_v4, %v916_v20  ;;  %v782_v24 = vperm.slane %v752_v19, 0 }
 0x241   : > { %v837_v21 = vpop.permute.xlu1 %836  ;;  %1388 = vrot.lane.b32.xlu2 %v2889_v10, %s2608_s29  ;;  %1392 = vrot.lane.b32.xlu1 %v2892_v11, %s2608_s29  ;;  %v2916_v32 = vmul.f32 %v2847_v60, %v952_v27  ;;  %vm891_vm14 = vcmp.gt.f32.partialorder %v859_v25, 0.0  ;;  %v923_v34 = vmul.f32 0.2, %v859_v25  ;;  %v2919_v35 = vmul.f32 %v2847_v60, %v950_v33 }
 0x242   : > { %1390 = vrot.lane.b32.xlu0 %v2897_v14, %s2608_s29  ;;  %v861_v29 = vadd.f32 %v837_v21, %v785_v0  ;;  %v864_v30 = vadd.f32 %v837_v21, %v788_v5  ;;  %v867_v31 = vadd.f32 %v837_v21, %v791_v7  ;;  %vm889_vm15 = vcmp.gt.f32.partialorder %v857_v26, 0.0 }
 0x243   : > { %v921_v36 = vmul.f32 0.2, %v857_v26  ;;  %v955_v37 = vsel %vm891_vm14, %v859_v25, %v923_v34  ;;  %v862_v51 = vadd.f32 %v837_v21, %v786_v8  ;;  %v865_v63 = vadd.f32 %v837_v21, %v789_v9 }
 0x244   : > { %vm893_vm0 = vcmp.gt.f32.partialorder %v861_v29, 0.0  ;;  %v925_v28 = vmul.f32 0.2, %v861_v29  ;;  %vm896_vm1 = vcmp.gt.f32.partialorder %v864_v30, 0.0  ;;  %v928_v38 = vmul.f32 0.2, %v864_v30 }
 0x245   : > { %v2922_v41 = vmul.f32 %v2847_v60, %v955_v37  ;;  %v953_v42 = vsel %vm889_vm15, %v857_v26, %v921_v36  ;;  %vm899_vm4 = vcmp.gt.f32.partialorder %v867_v31, 0.0  ;;  %v931_v44 = vmul.f32 0.2, %v867_v31 }
 0x246   : > { %v2925_v45 = vmul.f32 %v2847_v60, %v953_v42  ;;  %v957_v46 = vsel %vm893_vm0, %v861_v29, %v925_v28  ;;  %v960_v48 = vsel %vm896_vm1, %v864_v30, %v928_v38  ;;  %vm894_vm6 = vcmp.gt.f32.partialorder %v862_v51, 0.0 }
 0x247   : > { %v2933_v52 = vmul.f32 %v2847_v60, %v957_v46  ;;  %v2936_v55 = vmul.f32 %v2847_v60, %v960_v48  ;;  %v963_v56 = vsel %vm899_vm4, %v867_v31, %v931_v44  ;;  %v926_v62 = vmul.f32 0.2, %v862_v51 }
 0x248   : > { %v2941_v61 = vmul.f32 %v2847_v60, %v963_v56  ;;  %v860_v0 = vadd.f32 %v837_v21, %v784_v59  ;;  %v863_v1 = vadd.f32 %v837_v21, %v787_v16  ;;  %v866_v2 = vadd.f32 %v837_v21, %v790_v17 }
 0x249   : > { %1394 = vrot.lane.b32.xlu2 %v2900_v15, %s2608_s29  ;;  %1046 = vrot.lane.b32.xlu1 %v2863_v39, %s2607_s27  ;;  %v855_v39 = vadd.f32 %v2873_v47, %v2854_v18  ;;  %v958_v5 = vsel %vm894_vm6, %v862_v51, %v926_v62  ;;  %vm897_vm7 = vcmp.gt.f32.partialorder %v865_v63, 0.0  ;;  %v929_v6 = vmul.f32 0.2, %v865_v63 }
 0x24a   : > { %1396 = vrot.lane.b32.xlu0 %v2907_v22, %s2608_s29  ;;  %v2949_v7 = vmul.f32 %v2847_v60, %v958_v5  ;;  %vm892_vm8 = vcmp.gt.f32.partialorder %v860_v0, 0.0  ;;  %v924_v8 = vmul.f32 0.2, %v860_v0  ;;  %vm895_vm9 = vcmp.gt.f32.partialorder %v863_v1, 0.0 }
 0x24b   : > { %v961_v9 = vsel %vm897_vm7, %v865_v63, %v929_v6  ;;  %v927_v12 = vmul.f32 0.2, %v863_v1  ;;  %vm898_vm10 = vcmp.gt.f32.partialorder %v866_v2, 0.0  ;;  %v930_v18 = vmul.f32 0.2, %v866_v2 }
 0x24c   : > { %v986_v53 = vmul.f32 %v2847_v60, %v948_v3  ;;  %v2953_v59 = vmul.f32 %v2847_v60, %v961_v9  ;;  %v956_v13 = vsel %vm892_vm8, %v860_v0, %v924_v8  ;;  %v919_v4 = vmul.f32 0.2, %v855_v39 }
 0x24d   : > { %v2956_v16 = vmul.f32 %v2847_v60, %v956_v13  ;;  %v959_v17 = vsel %vm895_vm9, %v863_v1, %v927_v12  ;;  %v962_v21 = vsel %vm898_vm10, %v866_v2, %v930_v18  ;;  %vm887_vm11 = vcmp.gt.f32.partialorder %v855_v39, 0.0 }
 0x24e   : > { %v997_v20 = vmul.f32 %v2847_v60, %v959_v17  ;;  %v2963_v23 = vmul.f32 %v2847_v60, %v962_v21  ;;  %v951_v25 = vsel %vm887_vm11, %v855_v39, %v919_v4  ;;  %v858_v26 = vadd.f32 %v2873_v47, %v782_v24 }
 0x24f   : > { %v747_v27 = vrot.slane %v2820_v49, 1  ;;  %v989_v29 = vmul.f32 %v2847_v60, %v951_v25  ;;  %v792_v36 = vperm.slane %v2838_v57, 0  ;;  %v761_v46 = vrot.slane %v2838_v57, 1 }
 0x250   : > { %vm890_vm12 = vcmp.gt.f32.partialorder %v858_v26, 0.0  ;;  %v766_v2 = vrot.slane %v2838_v57, 6  ;;  %v764_v5 = vrot.slane %v2838_v57, 4  ;;  %v767_v17 = vrot.slane %v2838_v57, 7 }
 0x251   : > { %1398 = vrot.lane.b32.xlu1 %v986_v53, %s2608_s29  ;;  %1048 = vrot.lane.b32.xlu2 %v2870_v43, %s2607_s27  ;;  %v922_v43 = vmul.f32 0.2, %v858_v26  ;;  %v793_v56 = vperm.slane %v761_v46, 0  ;;  %vm1304_vm8 = vcmask 1041409   ;;  %vm1306_vm9 = vcmask 1042434  }
 0x252   : > { %1052 = vrot.lane.b32.xlu0 %v2889_v10, %s2607_s27  ;;  %v777_v10 = vperm.slane %v747_v27, 0  ;;  %v798_v9 = vperm.slane %v766_v2, 0  ;;  %v796_v18 = vperm.slane %v764_v5, 0  ;;  %v799_v27 = vperm.slane %v767_v17, 0 }
 0x253   : > { %v954_v30 = vsel %vm890_vm12, %v858_v26, %v922_v43  ;;  %vm1308_vm10 = vcmask 1043459   ;;  %vm1310_vm11 = vcmask 1044484   ;;  %vm1312_vm12 = vcmask 1045509  }
 0x254   : > { %v853_v19 = vadd.f32 %v2873_v47, %v777_v10  ;;  %v992_v31 = vmul.f32 %v2847_v60, %v954_v30  ;;  %v3016_v47 = vpop.permute.xlu2 %838 }
 0x255   : > { %v868_v44 = vadd.f32 %v3016_v47, %v792_v36  ;;  %v874_v13 = vadd.f32 %v3016_v47, %v798_v9  ;;  %v875_v10 = vadd.f32 %v3016_v47, %v799_v27 }
 0x256   : > { %v917_v33 = vmul.f32 0.2, %v853_v19  ;;  %vm885_vm13 = vcmp.gt.f32.partialorder %v853_v19, 0.0 }
 0x257   : > { %vm900_vm0 = vcmp.gt.f32.partialorder %v868_v44, 0.0  ;;  %v938_v26 = vmul.f32 0.2, %v874_v13  ;;  %vm906_vm5 = vcmp.gt.f32.partialorder %v874_v13, 0.0  ;;  %vm907_vm7 = vcmp.gt.f32.partialorder %v875_v10, 0.0 }
 0x258   : > { %v949_v49 = vsel %vm885_vm13, %v853_v19, %v917_v33  ;;  %vm1314_vm13 = vcmask 1046534  }
 0x259   : > { %1404 = vrot.lane.b32.xlu1 %v989_v29, %s2608_s29  ;;  %1050 = vrot.lane.b32.xlu2 %v2866_v40, %s2607_s27  ;;  %v987_v40 = vmul.f32 %v2847_v60, %v949_v49  ;;  %v939_v49 = vmul.f32 0.2, %v875_v10 }
 0x25a   : > { %1056 = vrot.lane.b32.xlu0 %v2892_v11, %s2607_s27  ;;  %v762_v11 = vrot.slane %v2838_v57, 2 }
 0x261   : > { %1410 = vrot.lane.b32.xlu1 %v992_v31, %s2608_s29  ;;  %1054 = vrot.lane.b32.xlu2 %v2897_v14, %s2607_s27  ;;  %v794_v14 = vperm.slane %v762_v11, 0  ;;  %v971_v11 = vsel %vm907_vm7, %v875_v10, %v939_v49 }
 0x262   : > { %1058 = vrot.lane.b32.xlu0 %v2900_v15, %s2607_s27 }
 0x269   : > { %1062 = vrot.lane.b32.xlu1 %v986_v53, %s2607_s27  ;;  %1400 = vrot.lane.b32.xlu2 %v987_v40, %s2608_s29 }
 0x26a   : > { %1060 = vrot.lane.b32.xlu0 %v2907_v22, %s2607_s27  ;;  %v870_v22 = vadd.f32 %v3016_v47, %v794_v14 }
 0x26c   : > { %v934_v34 = vmul.f32 0.2, %v870_v22  ;;  %vm902_vm14 = vcmp.gt.f32.partialorder %v870_v22, 0.0 }
 0x271   : > { %1068 = vrot.lane.b32.xlu1 %v989_v29, %s2607_s27  ;;  %1406 = vrot.lane.b32.xlu2 %v2916_v32, %s2608_s29 }
 0x272   : > { %1402 = vrot.lane.b32.xlu0 %v2919_v35, %s2608_s29 }
 0x279   : > { %1070 = vrot.lane.b32.xlu1 %v2916_v32, %s2607_s27  ;;  %1412 = vrot.lane.b32.xlu2 %v2922_v41, %s2608_s29  ;;  %v765_v32 = vrot.slane %v2838_v57, 5 }
 0x27a   : > { %1408 = vrot.lane.b32.xlu0 %v2925_v45, %s2608_s29 }
 0x281   : > { %1416 = vrot.lane.b32.xlu1 %v2933_v52, %s2608_s29  ;;  %1064 = vrot.lane.b32.xlu2 %v987_v40, %s2607_s27 }
 0x282   : > { %1066 = vrot.lane.b32.xlu0 %v2919_v35, %s2607_s27  ;;  %v797_v35 = vperm.slane %v765_v32, 0 }
 0x284   : > { %v873_v42 = vadd.f32 %v3016_v47, %v797_v35 }
 0x286   : > { %v937_v51 = vmul.f32 0.2, %v873_v42  ;;  %vm905_vm15 = vcmp.gt.f32.partialorder %v873_v42, 0.0 }
 0x288   : > { %v969_v39 = vsel %vm905_vm15, %v873_v42, %v937_v51 }
 0x289   : > { %1422 = vrot.lane.b32.xlu1 %v2936_v55, %s2608_s29  ;;  %1074 = vrot.lane.b32.xlu2 %v992_v31, %s2607_s27  ;;  %v1007_v6 = vmul.f32 %v2847_v60, %v969_v39 }
 0x28a   : > { %1072 = vrot.lane.b32.xlu0 %v2925_v45, %s2607_s27  ;;  %v763_v45 = vrot.slane %v2838_v57, 3  ;;  %v970_v57 = vsel %vm906_vm5, %v874_v13, %v938_v26 }
 0x28b   : > { %v1008_v30 = vmul.f32 %v2847_v60, %v970_v57 }
 0x291   : > { %1428 = vrot.lane.b32.xlu1 %v2941_v61, %s2608_s29  ;;  %1418 = vrot.lane.b32.xlu2 %v2949_v7, %s2608_s29 }
 0x292   : > { %1076 = vrot.lane.b32.xlu0 %v2922_v41, %s2607_s27  ;;  %v966_v41 = vsel %vm902_vm14, %v870_v22, %v934_v34  ;;  %vm1316_vm14 = vcmask 1047559  }
 0x293   : > { %v3025_v15 = vpop.permute.xlu2 %1382  ;;  %v3051_v48 = vmul.f32 %v2847_v60, %v966_v41 }
 0x299   : > { %1080 = vrot.lane.b32.xlu1 %v2933_v52, %s2607_s27  ;;  %1424 = vrot.lane.b32.xlu2 %v2953_v59, %s2608_s29  ;;  %v932_v52 = vmul.f32 0.2, %v868_v44 }
 0x29a   : > { %1414 = vrot.lane.b32.xlu0 %v2956_v16, %s2608_s29 }
 0x29b   : > { %v3040_v37 = vpop.permute.xlu2 %1388  ;;  %v964_v0 = vsel %vm900_vm0, %v868_v44, %v932_v52  ;;  %vm1347_vm0 = vcmask 64512  }
 0x2a1   : > { %1082 = vrot.lane.b32.xlu1 %v2949_v7, %s2607_s27  ;;  %1084 = vrot.lane.b32.xlu2 %v997_v20, %s2607_s27  ;;  %v1002_v7 = vmul.f32 %v2847_v60, %v964_v0 }
 0x2a2   : > { %1420 = vrot.lane.b32.xlu0 %v997_v20, %s2608_s29 }
 0x2a3   : > { %v3065_v3 = vpop.permute.xlu2 %1394 }
 0x2a9   : > { %1086 = vrot.lane.b32.xlu1 %v2936_v55, %s2607_s27  ;;  %1088 = vrot.lane.b32.xlu2 %v2953_v59, %s2607_s27  ;;  %v795_v55 = vperm.slane %v763_v45, 0 }
 0x2aa   : > { %1426 = vrot.lane.b32.xlu0 %v2963_v23, %s2608_s29 }
 0x2ab   : > { %v3042_v28 = vpop.permute.xlu1 %1386  ;;  %v871_v1 = vadd.f32 %v3016_v47, %v795_v55  ;;  %v3078_v20 = vpop.permute.xlu2 %1048 }
 0x2ac   : > { %v3044_v38 = vpop.permute.xlu0 %1384 }
 0x2ad   : > { %v935_v8 = vmul.f32 0.2, %v871_v1  ;;  %vm903_vm1 = vcmp.gt.f32.partialorder %v871_v1, 0.0  ;;  %v1481_v46 = vsel %vm636_vm2, %v3044_v38, 0.0 }
 0x2af   : > { %v967_v59 = vsel %vm903_vm1, %v871_v1, %v935_v8 }
 0x2b0   : > { %v1005_v24 = vmul.f32 %v2847_v60, %v967_v59 }
 0x2b1   : > { %1434 = vrot.lane.b32.xlu1 %v3051_v48, %s2608_s29  ;;  %1092 = vrot.lane.b32.xlu2 %v2941_v61, %s2607_s27  ;;  %v869_v61 = vadd.f32 %v3016_v47, %v793_v56 }
 0x2b2   : > { %1078 = vrot.lane.b32.xlu0 %v2956_v16, %s2607_s27  ;;  %v872_v16 = vadd.f32 %v3016_v47, %v796_v18  ;;  %v1009_v47 = vmul.f32 %v2847_v60, %v971_v11  ;;  %v1487_v18 = vsel %vm636_vm2, %v3040_v37, 0.0 }
 0x2b3   : > { %v3059_v62 = vpop.permute.xlu1 %1392  ;;  %v933_v12 = vmul.f32 0.2, %v869_v61  ;;  %vm901_vm4 = vcmp.gt.f32.partialorder %v869_v61, 0.0  ;;  %v3090_v33 = vpop.permute.xlu2 %1050 }
 0x2b4   : > { %v3061_v63 = vpop.permute.xlu0 %1390  ;;  %vm904_vm6 = vcmp.gt.f32.partialorder %v872_v16, 0.0  ;;  %v1493_v9 = vsel %vm636_vm2, %v3059_v62, 0.0  ;;  %v1496_v62 = vsel %vm636_vm2, %v3065_v3, 0.0  ;;  %v1148_v37 = vsel %vm636_vm2, %v3090_v33, 0.0 }
 0x2b5   : > { %v965_v4 = vsel %vm901_vm4, %v869_v61, %v933_v12  ;;  %v1490_v52 = vsel %vm636_vm2, %v3061_v63, 0.0  ;;  %v1478_v61 = vsel %vm636_vm2, %v3025_v15, 0.0 }
 0x2b6   : > { %v1003_v25 = vmul.f32 %v2847_v60, %v965_v4 }
 0x2b9   : > { %1440 = vrot.lane.b32.xlu1 %v1007_v6, %s2608_s29  ;;  %1430 = vrot.lane.b32.xlu2 %v1002_v7, %s2608_s29 }
 0x2ba   : > { %1090 = vrot.lane.b32.xlu0 %v2963_v23, %s2607_s27  ;;  %v936_v23 = vmul.f32 0.2, %v872_v16 }
 0x2bb   : > { %v1047_v21 = vpop.permute.xlu1 %1046  ;;  %v3102_v22 = vpop.permute.xlu2 %1054 }
 0x2bc   : > { %v1397_v53 = vpop.permute.xlu0 %1396  ;;  %v968_v43 = vsel %vm904_vm6, %v872_v16, %v936_v23  ;;  %v1142_v2 = vsel %vm636_vm2, %v1047_v21, 0.0  ;;  %v1154_v23 = vsel %vm636_vm2, %v3102_v22, 0.0 }
 0x2bd   : > { %v1006_v31 = vmul.f32 %v2847_v60, %v968_v43  ;;  %v1499_v39 = vsel %vm636_vm2, %v1397_v53, 0.0  ;;  %v1145_v53 = vsel %vm636_vm2, %v3078_v20, 0.0 }
 0x2c1   : > { %1100 = vrot.lane.b32.xlu1 %v1005_v24, %s2607_s27  ;;  %1436 = vrot.lane.b32.xlu2 %v1005_v24, %s2608_s29 }
 0x2c2   : > { %1432 = vrot.lane.b32.xlu0 %v1003_v25, %s2608_s29 }
 0x2c3   : > { %v1399_v19 = vpop.permute.xlu1 %1398  ;;  %v1401_v35 = vpop.permute.xlu2 %1400 }
 0x2c4   : > { %v3085_v29 = vpop.permute.xlu0 %1052  ;;  %v1505_v4 = vsel %vm636_vm2, %v1401_v35, 0.0 }
 0x2c5   : > { %v1151_v21 = vsel %vm636_vm2, %v3085_v29, 0.0 }
 0x2c9   : > { %1104 = vrot.lane.b32.xlu1 %v1007_v6, %s2607_s27  ;;  %1442 = vrot.lane.b32.xlu2 %v1008_v30, %s2608_s29  ;;  %v1484_v6 = vsel %vm636_vm2, %v3042_v28, 0.0  ;;  %v1502_v28 = vsel %vm636_vm2, %v1399_v19, 0.0 }
 0x2ca   : > { %1438 = vrot.lane.b32.xlu0 %v1006_v31, %s2608_s29 }
 0x2cb   : > { %v3099_v14 = vpop.permute.xlu1 %1404  ;;  %v3115_v41 = vpop.permute.xlu2 %1406 }
 0x2cc   : > { %v3095_v40 = vpop.permute.xlu0 %1056  ;;  %v1511_v3 = vsel %vm636_vm2, %v3099_v14, 0.0 }
 0x2cd   : > { %v1157_v20 = vsel %vm636_vm2, %v3095_v40, 0.0 }
 0x2d1   : > { %1094 = vrot.lane.b32.xlu2 %v1002_v7, %s2607_s27 }
 0x2d2   : > { %1444 = vrot.lane.b32.xlu0 %v1009_v47, %s2608_s29 }
 0x2d3   : > { %v3107_v34 = vpop.permute.xlu1 %1410  ;;  %v3120_v45 = vpop.permute.xlu2 %1412 }
 0x2d4   : > { %v1059_v32 = vpop.permute.xlu0 %1058  ;;  %v1520_v27 = vsel %vm636_vm2, %v3107_v34, 0.0 }
 0x2d5   : > { %v1160_v7 = vsel %vm636_vm2, %v1059_v32, 0.0 }
 0x2d9   : > { %1098 = vrot.lane.b32.xlu2 %v3051_v48, %s2607_s27 }
 0x2da   : > { %1096 = vrot.lane.b32.xlu0 %v1003_v25, %s2607_s27 }
 0x2db   : > { %v3113_v60 = vpop.permute.xlu1 %1062  ;;  %v3128_v55 = vpop.permute.xlu2 %1064 }
 0x2dc   : > { %v3109_v36 = vpop.permute.xlu0 %1060 }
 0x2e1   : > { %1106 = vrot.lane.b32.xlu2 %v1008_v30, %s2607_s27  ;;  %v1166_v30 = vsel %vm636_vm2, %v3113_v60, 0.0  ;;  %v1169_v60 = vsel %vm636_vm2, %v3128_v55, 0.0 }
 0x2e2   : > { %1102 = vrot.lane.b32.xlu0 %v1006_v31, %s2607_s27  ;;  %v1514_v31 = vsel %vm636_vm2, %v3115_v41, 0.0 }
 0x2e3   : > { %v3118_v44 = vpop.permute.xlu1 %1068  ;;  %v3135_v1 = vpop.permute.xlu2 %1074 }
 0x2e4   : > { %v1403_v42 = vpop.permute.xlu0 %1402  ;;  %v1175_v11 = vsel %vm636_vm2, %v3118_v44, 0.0 }
 0x2e5   : > { %v1508_v29 = vsel %vm636_vm2, %v1403_v42, 0.0 }
 0x2e9   : > { %1108 = vrot.lane.b32.xlu2 %v1009_v47, %s2607_s27  ;;  %v1523_v47 = vsel %vm636_vm2, %v3120_v45, 0.0  ;;  %v1184_v45 = vsel %vm636_vm2, %v3135_v1, 0.0 }
 0x2eb   : > { %v3124_v51 = vpop.permute.xlu1 %1070  ;;  %v3144_v5 = vpop.permute.xlu2 %1418 }
 0x2ec   : > { %v1409_v48 = vpop.permute.xlu0 %1408  ;;  %v1178_v34 = vsel %vm636_vm2, %v3124_v51, 0.0 }
 0x2ed   : > { %v1517_v10 = vsel %vm636_vm2, %v1409_v48, 0.0 }
 0x2f3   : > { %1482 = vadd.xlane.f32.xlu1 %v1481_v46  ;;  %v3133_v0 = vpop.permute.xlu1 %1416  ;;  %v3155_v12 = vpop.permute.xlu2 %1424 }
 0x2f4   : > { %v3130_v56 = vpop.permute.xlu0 %1066  ;;  %v1529_v44 = vsel %vm636_vm2, %v3133_v0, 0.0 }
 0x2f5   : > { %v1172_v40 = vsel %vm636_vm2, %v3130_v56, 0.0  ;;  %v1532_v56 = vsel %vm636_vm2, %v3144_v5, 0.0 }
 0x2fb   : > { %1491 = vadd.xlane.f32.xlu1 %v1490_v52  ;;  %v3142_v63 = vpop.permute.xlu1 %1422  ;;  %v3167_v16 = vpop.permute.xlu2 %1084 }
 0x2fc   : > { %v3137_v38 = vpop.permute.xlu0 %1072  ;;  %v1538_v55 = vsel %vm636_vm2, %v3142_v63, 0.0 }
 0x2fd   : > { %v1181_v22 = vsel %vm636_vm2, %v3137_v38, 0.0 }
 0x303   : > { %1500 = vadd.xlane.f32.xlu1 %v1499_v39  ;;  %v3153_v15 = vpop.permute.xlu1 %1428  ;;  %v3179_v25 = vpop.permute.xlu2 %1088 }
 0x304   : > { %v3149_v8 = vpop.permute.xlu0 %1076  ;;  %v1547_v38 = vsel %vm636_vm2, %v3153_v15, 0.0 }
 0x305   : > { %v1187_v42 = vsel %vm636_vm2, %v3149_v8, 0.0  ;;  %v1205_v8 = vsel %vm636_vm2, %v3179_v25, 0.0 }
 0x30b   : > { %1143 = vadd.xlane.f32.xlu1 %v1142_v2  ;;  %v3164_v13 = vpop.permute.xlu1 %1080  ;;  %v3188_v43 = vpop.permute.xlu2 %1092 }
 0x30c   : > { %1479 = vadd.xlane.f32.xlu0 %v1478_v61  ;;  %v1415_v59 = vpop.permute.xlu0 %1414  ;;  %v1541_v61 = vsel %vm636_vm2, %v3155_v12, 0.0 }
 0x30d   : > { %v1526_v52 = vsel %vm636_vm2, %v1415_v59, 0.0 }
 0x312   : > { %1485 = vadd.xlane.f32.xlu2 %v1484_v6 }
 0x313   : > { %1161 = vadd.xlane.f32.xlu1 %v1160_v7  ;;  %v3177_v24 = vpop.permute.xlu1 %1082  ;;  %v1431_v49 = vpop.permute.xlu2 %1430  ;;  %v1193_v7 = vsel %vm636_vm2, %v3164_v13, 0.0 }
 0x314   : > { %1494 = vadd.xlane.f32.xlu0 %v1493_v9  ;;  %v1421_v17 = vpop.permute.xlu0 %1420 }
 0x315   : > { %v1535_v1 = vsel %vm636_vm2, %v1421_v17, 0.0 }
 0x31a   : > { %1488 = vadd.xlane.f32.xlu2 %v1487_v18  ;;  %v1196_v18 = vsel %vm636_vm2, %v3177_v24, 0.0 }
 0x31b   : > { %1503 = vadd.xlane.f32.xlu1 %v1502_v28  ;;  %v3186_v57 = vpop.permute.xlu1 %1086  ;;  %v1437_v35 = vpop.permute.xlu2 %1436 }
 0x31c   : > { %1146 = vadd.xlane.f32.xlu0 %v1145_v53  ;;  %v1427_v26 = vpop.permute.xlu0 %1426  ;;  %v1550_v53 = vsel %vm636_vm2, %v1431_v49, 0.0  ;;  %v1202_v13 = vsel %vm636_vm2, %v3186_v57, 0.0 }
 0x31d   : > { %v1544_v5 = vsel %vm636_vm2, %v1427_v26, 0.0 }
 0x322   : > { %1497 = vadd.xlane.f32.xlu2 %v1496_v62 }
 0x323   : > { %1506 = vadd.xlane.f32.xlu1 %v1505_v4  ;;  %v3195_v33 = vpop.permute.xlu1 %1434  ;;  %v1443_v48 = vpop.permute.xlu2 %1442  ;;  %v1199_v4 = vsel %vm636_vm2, %v3167_v16, 0.0 }
 0x324   : > { %1149 = vadd.xlane.f32.xlu0 %v1148_v37  ;;  %v1079_v19 = vpop.permute.xlu0 %1078  ;;  %v1559_v37 = vsel %vm636_vm2, %v1437_v35, 0.0  ;;  %v1556_v24 = vsel %vm636_vm2, %v3195_v33, 0.0  ;;  %v1568_v25 = vsel %vm636_vm2, %v1443_v48, 0.0 }
 0x325   : > { %v1190_v12 = vsel %vm636_vm2, %v1079_v19, 0.0 }
 0x32a   : > { %1152 = vadd.xlane.f32.xlu2 %v1151_v21 }
 0x32b   : > { %1512 = vadd.xlane.f32.xlu1 %v1511_v3  ;;  %v3207_v32 = vpop.permute.xlu1 %1440  ;;  %v1095_v0 = vpop.permute.xlu2 %1094 }
 0x32c   : > { %1158 = vadd.xlane.f32.xlu0 %v1157_v20  ;;  %v3203_v14 = vpop.permute.xlu0 %1090  ;;  %v1565_v57 = vsel %vm636_vm2, %v3207_v32, 0.0 }
 0x332   : > { %1155 = vadd.xlane.f32.xlu2 %v1154_v23 }
 0x333   : > { %1521 = vadd.xlane.f32.xlu1 %v1520_v27  ;;  %v3219_v46 = vpop.permute.xlu1 %1100  ;;  %v1099_v6 = vpop.permute.xlu2 %1098 }
 0x334   : > { %1509 = vadd.xlane.f32.xlu0 %v1508_v29  ;;  %v1433_v41 = vpop.permute.xlu0 %1432  ;;  %v1270_v29 = vlaneseq  ;;  %v1220_v32 = vsel %vm636_vm2, %v1099_v6, 0.0 }
 0x335   : > { %v1553_v20 = vsel %vm636_vm2, %v1433_v41, 0.0 }
 0x336   : > { %v3270_v19 = vand.u32 127, %v1270_v29 }
 0x33a   : > { %1518 = vadd.xlane.f32.xlu2 %v1517_v10  ;;  %v1214_v10 = vsel %vm636_vm2, %v1095_v0, 0.0 }
 0x33b   : > { %1167 = vadd.xlane.f32.xlu1 %v1166_v30  ;;  %v3226_v39 = vpop.permute.xlu1 %1104  ;;  %v1107_v28 = vpop.permute.xlu2 %1106 }
 0x33c   : > { %1515 = vadd.xlane.f32.xlu0 %v1514_v31  ;;  %v1439_v51 = vpop.permute.xlu0 %1438  ;;  %v1232_v48 = vsel %vm636_vm2, %v1107_v28, 0.0 }
 0x33d   : > { %v1562_v27 = vsel %vm636_vm2, %v1439_v51, 0.0 }
 0x342   : > { %1173 = vadd.xlane.f32.xlu2 %v1172_v40 }
 0x343   : > { %1176 = vadd.xlane.f32.xlu1 %v1175_v11  ;;  %v3255_v17 = vpop.permute.xlu2 %1108 }
 0x344   : > { %1524 = vadd.xlane.f32.xlu0 %v1523_v47  ;;  %v1445_v2 = vpop.permute.xlu0 %1444 }
 0x345   : > { %v1571_v11 = vsel %vm636_vm2, %v1445_v2, 0.0 }
 0x34a   : > { %1182 = vadd.xlane.f32.xlu2 %v1181_v22  ;;  %v1223_v22 = vsel %vm636_vm2, %v3219_v46, 0.0 }
 0x34b   : > { %1179 = vadd.xlane.f32.xlu1 %v1178_v34 }
 0x34c   : > { %1170 = vadd.xlane.f32.xlu0 %v1169_v60  ;;  %v1097_v9 = vpop.permute.xlu0 %1096 }
 0x352   : > { %1188 = vadd.xlane.f32.xlu2 %v1187_v42  ;;  %v1217_v42 = vsel %vm636_vm2, %v1097_v9, 0.0 }
 0x353   : > { %1530 = vadd.xlane.f32.xlu1 %v1529_v44 }
 0x354   : > { %1185 = vadd.xlane.f32.xlu0 %v1184_v45  ;;  %v3248_v62 = vpop.permute.xlu0 %1102  ;;  %v1229_v45 = vsel %vm636_vm2, %v3226_v39, 0.0 }
 0x35a   : > { %1527 = vadd.xlane.f32.xlu2 %v1526_v52 }
 0x35b   : > { %1539 = vadd.xlane.f32.xlu1 %v1538_v55 }
 0x35c   : > { %1533 = vadd.xlane.f32.xlu0 %v1532_v56 }
 0x362   : > { %1536 = vadd.xlane.f32.xlu2 %v1535_v1 }
 0x363   : > { %1548 = vadd.xlane.f32.xlu1 %v1547_v38 }
 0x364   : > { %1542 = vadd.xlane.f32.xlu0 %v1541_v61 }
 0x366   : > { %v3233_v63 = vpop.xlane.xlu1 %1482 }
 0x367   : > { %v1607_v52 = vperm.slane %v3233_v63, %v3270_v19  ;;  %v1226_v63 = vsel %vm636_vm2, %v3248_v62, 0.0 }
 0x36a   : > { %1545 = vadd.xlane.f32.xlu2 %v1544_v5 }
 0x36b   : > { %1194 = vadd.xlane.f32.xlu1 %v1193_v7  ;;  %v1208_v7 = vsel %vm636_vm2, %v3203_v14, 0.0 }
 0x36c   : > { %1206 = vadd.xlane.f32.xlu0 %v1205_v8  ;;  %v1235_v8 = vsel %vm636_vm2, %v3255_v17, 0.0 }
 0x36e   : > { %v3240_v15 = vpop.xlane.xlu1 %1491 }
 0x36f   : > { %v1610_v5 = vperm.slane %v3240_v15, %v3270_v19 }
 0x372   : > { %1191 = vadd.xlane.f32.xlu2 %v1190_v12 }
 0x373   : > { %1197 = vadd.xlane.f32.xlu1 %v1196_v18 }
 0x374   : > { %1551 = vadd.xlane.f32.xlu0 %v1550_v53 }
 0x376   : > { %v3246_v59 = vpop.xlane.xlu1 %1500 }
 0x377   : > { %v1613_v17 = vperm.slane %v3246_v59, %v3270_v19 }
 0x37a   : > { %1203 = vadd.xlane.f32.xlu2 %v1202_v13 }
 0x37b   : > { %1200 = vadd.xlane.f32.xlu1 %v1199_v4  ;;  %v3320_v4 = vld [vmem:[%s3312_s23] sm:$0xff] }
 0x37c   : > { %1560 = vadd.xlane.f32.xlu0 %v1559_v37  ;;  %vm1010_vm15 = vcmp.gt.f32.partialorder %v3320_v4, 0.0 }
 0x37e   : > { %v1144_v21 = vpop.xlane.xlu1 %1143 }
 0x37f   : > { %v1480_v3 = vpop.xlane.xlu0 %1479  ;;  %v1272_v49 = vperm.slane %v1144_v21, %v3270_v19  ;;  %v1163_v21 = vsel %vm636_vm2, %v3109_v36, 0.0 }
 0x380   : > { %v1606_v46 = vperm.slane %v1480_v3, %v3270_v19 }
 0x382   : > { %1554 = vadd.xlane.f32.xlu2 %v1553_v20  ;;  %v1638_v39 = vsel %vm1304_vm8, %v1607_v52, %v1606_v46 }
 0x383   : > { %1557 = vadd.xlane.f32.xlu1 %v1556_v24  ;;  %v1211_v24 = vsel %vm636_vm2, %v3188_v43, 0.0 }
 0x384   : > { %1569 = vadd.xlane.f32.xlu0 %v1568_v25 }
 0x385   : > { %v1486_v26 = vpop.xlane.xlu2 %1485 }
 0x386   : > { %v3261_v16 = vpop.xlane.xlu1 %1161  ;;  %v1608_v51 = vperm.slane %v1486_v26, %v3270_v19 }
 0x387   : > { %v3263_v23 = vpop.xlane.xlu0 %1494  ;;  %v1278_v36 = vperm.slane %v3261_v16, %v3270_v19 }
 0x388   : > { %v1639_v2 = vsel %vm1306_vm9, %v1608_v51, %v1638_v39  ;;  %v1611_v14 = vperm.slane %v3263_v23, %v3270_v19 }
 0x38a   : > { %1563 = vadd.xlane.f32.xlu2 %v1562_v27 }
 0x38b   : > { %1566 = vadd.xlane.f32.xlu1 %v1565_v57 }
 0x38c   : > { %1215 = vadd.xlane.f32.xlu0 %v1214_v10 }
 0x38d   : > { %v1489_v30 = vpop.xlane.xlu2 %1488 }
 0x38e   : > { %v3272_v31 = vpop.xlane.xlu1 %1503  ;;  %v1609_v55 = vperm.slane %v1489_v30, %v3270_v19 }
 0x38f   : > { %v1147_v33 = vpop.xlane.xlu0 %1146  ;;  %v1614_v26 = vperm.slane %v3272_v31, %v3270_v19 }
 0x390   : > { %v1273_v40 = vperm.slane %v1147_v33, %v3270_v19  ;;  %v1640_v6 = vsel %vm1308_vm10, %v1609_v55, %v1639_v2 }
 0x391   : > { %v1641_v9 = vsel %vm1310_vm11, %v1610_v5, %v1640_v6 }
 0x392   : > { %v1305_v47 = vsel %vm1304_vm8, %v1273_v40, %v1272_v49  ;;  %1572 = vadd.xlane.f32.xlu2 %v1571_v11  ;;  %v1642_v62 = vsel %vm1312_vm12, %v1611_v14, %v1641_v9 }
 0x393   : > { %1224 = vadd.xlane.f32.xlu1 %v1223_v22 }
 0x394   : > { %1221 = vadd.xlane.f32.xlu0 %v1220_v32 }
 0x395   : > { %v1498_v34 = vpop.xlane.xlu2 %1497 }
 0x396   : > { %v1507_v35 = vpop.xlane.xlu1 %1506  ;;  %v1612_v12 = vperm.slane %v1498_v34, %v3270_v19  ;;  %v3356_v34 = vld [vmem:[%s3312_s23 + $0x8] sm:$0xff] }
 0x397   : > { %v1150_v60 = vpop.xlane.xlu0 %1149  ;;  %v1615_v3 = vperm.slane %v1507_v35, %v3270_v19  ;;  %vm1011_vm2 = vcmp.gt.f32.partialorder %v3356_v34, 0.0 }
 0x398   : > { %v1274_v41 = vperm.slane %v1150_v60, %v3270_v19  ;;  %v1643_v37 = vsel %vm1314_vm13, %v1612_v12, %v1642_v62 }
 0x399   : > { %v1644_v25 = vsel %vm1316_vm14, %v1613_v17, %v1643_v37  ;;  %v1645_v27 = vsel %vm1304_vm8, %v1615_v3, %v1614_v26 }
 0x39a   : > { %v1307_v44 = vsel %vm1306_vm9, %v1274_v41, %v1305_v47  ;;  %1218 = vadd.xlane.f32.xlu2 %v1217_v42  ;;  %v3341_v43 = vsel %vm1010_vm15, %v1644_v25, -1e+30 }
 0x39b   : > { %1230 = vadd.xlane.f32.xlu1 %v1229_v45  ;;  %v1674_v40 = vsel %vm1347_vm0, %v3341_v43, -inf }
 0x39c   : > { %1233 = vadd.xlane.f32.xlu0 %v1232_v48 }
 0x39d   : > { %v1153_v56 = vpop.xlane.xlu2 %1152 }
 0x39e   : > { %v1275_v0 = vperm.slane %v1153_v56, %v3270_v19  ;;  %v1513_v1 = vpop.xlane.xlu1 %1512 }
 0x39f   : > { %v1159_v38 = vpop.xlane.xlu0 %1158  ;;  %v1617_v16 = vperm.slane %v1513_v1, %v3270_v19 }
 0x3a0   : > { %v1309_v61 = vsel %vm1308_vm10, %v1275_v0, %v1307_v44  ;;  %v1277_v59 = vperm.slane %v1159_v38, %v3270_v19 }
 0x3a2   : > { %1227 = vadd.xlane.f32.xlu2 %v1226_v63 }
 0x3a3   : > { %1209 = vadd.xlane.f32.xlu1 %v1208_v7 }
 0x3a4   : > { %1236 = vadd.xlane.f32.xlu0 %v1235_v8 }
 0x3a5   : > { %v1156_v15 = vpop.xlane.xlu2 %1155 }
 0x3a6   : > { %v1276_v18 = vperm.slane %v1156_v15, %v3270_v19  ;;  %v1522_v28 = vpop.xlane.xlu1 %1521 }
 0x3a7   : > { %v1510_v53 = vpop.xlane.xlu0 %1509  ;;  %v1620_v41 = vperm.slane %v1522_v28, %v3270_v19 }
 0x3a8   : > { %v1311_v13 = vsel %vm1310_vm11, %v1276_v18, %v1309_v61  ;;  %v1616_v20 = vperm.slane %v1510_v53, %v3270_v19 }
 0x3a9   : > { %v1313_v10 = vsel %vm1312_vm12, %v1277_v59, %v1311_v13 }
 0x3aa   : > { %1164 = vadd.xlane.f32.xlu2 %v1163_v21  ;;  %v1646_v30 = vsel %vm1306_vm9, %v1616_v20, %v1645_v27  ;;  %v3346_v33 = vsel %vm1314_vm13, %v1278_v36, %v1313_v10 }
 0x3ab   : > { %v1647_v11 = vsel %vm1308_vm10, %v1617_v16, %v1646_v30  ;;  %v3402_v16 = vld [vmem:[%s3312_s23 + $0x10] sm:$0xff] }
 0x3ac   : > { %1212 = vadd.xlane.f32.xlu0 %v1211_v24  ;;  %vm1012_vm1 = vcmp.gt.f32.partialorder %v3402_v16, 0.0 }
 0x3ad   : > { %v1519_v23 = vpop.xlane.xlu2 %1518 }
 0x3ae   : > { %v1168_v57 = vpop.xlane.xlu1 %1167  ;;  %v1619_v22 = vperm.slane %v1519_v23, %v3270_v19 }
 0x3af   : > { %v1516_v31 = vpop.xlane.xlu0 %1515  ;;  %v1280_v0 = vperm.slane %v1168_v57, %v3270_v19 }
 0x3b0   : > { %v1618_v49 = vperm.slane %v1516_v31, %v3270_v19 }
 0x3b2   : > { %1675 = vmax.xlane.f32.xlu2 %v1674_v40  ;;  %v1648_v47 = vsel %vm1310_vm11, %v1618_v49, %v1647_v11 }
 0x3b3   : > { %v1649_v60 = vsel %vm1312_vm12, %v1619_v22, %v1648_v47 }
 0x3b4   : > { %v1650_v45 = vsel %vm1314_vm13, %v1620_v41, %v1649_v60 }
 0x3b5   : > { %v1174_v32 = vpop.xlane.xlu2 %1173 }
 0x3b6   : > { %v1177_v35 = vpop.xlane.xlu1 %1176  ;;  %v1282_v39 = vperm.slane %v1174_v32, %v3270_v19 }
 0x3b7   : > { %v1525_v42 = vpop.xlane.xlu0 %1524  ;;  %v1283_v38 = vperm.slane %v1177_v35, %v3270_v19 }
 0x3b8   : > { %v1621_v44 = vperm.slane %v1525_v42, %v3270_v19 }
 0x3ba   : > { %v1651_v46 = vsel %vm1316_vm14, %v1621_v44, %v1650_v45 }
 0x3bb   : > { %v3366_v48 = vsel %vm1011_vm2, %v1651_v46, -1e+30 }
 0x3bc   : > { %v1677_v51 = vsel %vm1347_vm0, %v3366_v48, -inf }
 0x3bd   : > { %1678 = vmax.xlane.f32.xlu1 %v1677_v51  ;;  %v1183_v52 = vpop.xlane.xlu2 %1182 }
 0x3be   : > { %v1180_v55 = vpop.xlane.xlu1 %1179  ;;  %v1285_v9 = vperm.slane %v1183_v52, %v3270_v19 }
 0x3bf   : > { %v1171_v56 = vpop.xlane.xlu0 %1170  ;;  %v1284_v6 = vperm.slane %v1180_v55, %v3270_v19 }
 0x3c0   : > { %v1281_v1 = vperm.slane %v1171_v56, %v3270_v19 }
 0x3c2   : > { %v1318_v2 = vsel %vm1304_vm8, %v1281_v1, %v1280_v0 }
 0x3c3   : > { %v1319_v61 = vsel %vm1306_vm9, %v1282_v39, %v1318_v2 }
 0x3c4   : > { %v1320_v63 = vsel %vm1308_vm10, %v1283_v38, %v1319_v61 }
 0x3c5   : > { %v1189_v5 = vpop.xlane.xlu2 %1188  ;;  %v1321_v8 = vsel %vm1310_vm11, %v1284_v6, %v1320_v63 }
 0x3c6   : > { %v1531_v7 = vpop.xlane.xlu1 %1530  ;;  %v1287_v15 = vperm.slane %v1189_v5, %v3270_v19  ;;  %v1322_v18 = vsel %vm1312_vm12, %v1285_v9, %v1321_v8 }
 0x3c7   : > { %v1186_v12 = vpop.xlane.xlu0 %1185  ;;  %v1623_v20 = vperm.slane %v1531_v7, %v3270_v19 }
 0x3c8   : > { %v1286_v14 = vperm.slane %v1186_v12, %v3270_v19 }
 0x3ca   : > { %v1323_v28 = vsel %vm1314_vm13, %v1286_v14, %v1322_v18  ;;  %v3431_v18 = vld [vmem:[%s3312_s23 + $0x18] sm:$0xff]  ;;  %s2267_s23 = sshll.u32 %s2707_s17, 2 }
 0x3cb   : > { %v1324_v53 = vsel %vm1316_vm14, %v1287_v15, %v1323_v28  ;;  %vm1013_vm4 = vcmp.gt.f32.partialorder %v3431_v18, 0.0  ;;  %s2097_s21 = scalar_lea.hbm %s3614_s14, %s2267_s23  ;;  %s2545_s23 = scalar_lea.hbm %s3614_s14, 8 }
 0x3cc   : > { %v3387_v62 = vsel %vm1011_vm2, %v1324_v53, -1e+30  ;;  %s2101_s22 = sshll.u32 %s2097_s21, 4  ;;  %s2102_s22 = int_to_ptr.hbm [resolvable:$true] %s2101_s22 }
 0x3cd   : > { %v1528_v13 = vpop.xlane.xlu2 %1527  ;;  %v1351_v37 = vsel %vm1347_vm0, %v3387_v62, -inf  ;;  %s2539_s20 = sshra.s32 %s2102_s22, 4  ;;  %s2540_s20 = int_to_ptr.hbm [resolvable:$true] %s2539_s20 }
 0x3ce   : > { %1352 = vmax.xlane.f32.xlu1 %v1351_v37  ;;  %v1540_v17 = vpop.xlane.xlu1 %1539  ;;  %v1622_v3 = vperm.slane %v1528_v13, %v3270_v19  ;;  %s2541_s17 = scalar_lea.hbm %s2540_s20, 4  ;;  %p2546_p3 = scmp.lt.s32.totalorder %s2540_s20, %s3614_s14 }
 0x3cf   : > { %v1534_v21 = vpop.xlane.xlu0 %1533  ;;  %v1626_v10 = vperm.slane %v1540_v17, %v3270_v19  ;;  %p2542_p0 = scmp.ne.s32.totalorder %s2540_s20, %s2541_s17  ;;  %p2547_p4 = scmp.lt.s32.totalorder %s2545_s23, %s2541_s17 }
 0x3d0   : > { %v1624_v24 = vperm.slane %v1534_v21, %v3270_v19  ;;  %v1652_v25 = vsel %vm1304_vm8, %v1623_v20, %v1622_v3 }
 0x3d1   : > { %p2543_p1 = pnand %p2542_p0, %p2724_p5  ;;  %p2548_p7 = por %p2547_p4, %p2546_p3 }
 0x3d2   : > { %v1653_v27 = vsel %vm1306_vm9, %v1624_v24, %v1652_v25 }
 0x3d3   : > { %p2544_p2 = pneg %p2543_p1 }
 0x3d5   : > { %v1537_v26 = vpop.xlane.xlu2 %1536  ;;  %p2549_p8 = pnand %p2548_p7, %p2544_p2 }
 0x3d6   : > { %v1625_v59 = vperm.slane %v1537_v26, %v3270_v19  ;;  %v1549_v36 = vpop.xlane.xlu1 %1548 }
 0x3d7   : > { %v1543_v23 = vpop.xlane.xlu0 %1542  ;;  %v1629_v47 = vperm.slane %v1549_v36, %v3270_v19 }
 0x3d8   : > { %v1654_v57 = vsel %vm1308_vm10, %v1625_v59, %v1653_v27  ;;  %v1627_v30 = vperm.slane %v1543_v23, %v3270_v19 }
 0x3d9   : > { %v1655_v31 = vsel %vm1310_vm11, %v1626_v10, %v1654_v57 }
 0x3da   : > { %v1656_v22 = vsel %vm1312_vm12, %v1627_v30, %v1655_v31 }
 0x3dd   : > { %v1546_v49 = vpop.xlane.xlu2 %1545 }
 0x3de   : > { %v1628_v40 = vperm.slane %v1546_v49, %v3270_v19  ;;  %v1195_v11 = vpop.xlane.xlu1 %1194 }
 0x3df   : > { %v3407_v32 = vpop.xlane.xlu0 %1206  ;;  %v1289_v31 = vperm.slane %v1195_v11, %v3270_v19 }
 0x3e0   : > { %v1657_v35 = vsel %vm1314_vm13, %v1628_v40, %v1656_v22 }
 0x3e1   : > { %v1658_v60 = vsel %vm1316_vm14, %v1629_v47, %v1657_v35 }
 0x3e2   : > { %v3414_v41 = vsel %vm1012_vm1, %v1658_v60, -1e+30 }
 0x3e3   : > { %v1680_v42 = vsel %vm1347_vm0, %v3414_v41, -inf }
 0x3e4   : > { %1681 = vmax.xlane.f32.xlu0 %v1680_v42 }
 0x3e5   : > { %v1192_v44 = vpop.xlane.xlu2 %1191 }
 0x3e6   : > { %v1198_v45 = vpop.xlane.xlu1 %1197  ;;  %v1288_v10 = vperm.slane %v1192_v44, %v3270_v19 }
 0x3e7   : > { %v1552_v46 = vpop.xlane.xlu0 %1551  ;;  %v1290_v40 = vperm.slane %v1198_v45, %v3270_v19 }
 0x3e8   : > { %v1630_v38 = vperm.slane %v1552_v46, %v3270_v19  ;;  %v1325_v35 = vsel %vm1304_vm8, %v1289_v31, %v1288_v10 }
 0x3e9   : > { %v1326_v45 = vsel %vm1306_vm9, %v1290_v40, %v1325_v35  ;;  %v2404_v40 = vld [vmem:[%s3610_s10] ss:$0 sm:$0xff] }
 0x3ed   : > { %v3418_v51 = vpop.xlane.xlu2 %1203 }
 0x3ee   : > { %v1201_v52 = vpop.xlane.xlu1 %1200 }
 0x3ef   : > { %v1561_v55 = vpop.xlane.xlu0 %1560  ;;  %v1291_v60 = vperm.slane %v1201_v52, %v3270_v19 }
 0x3f0   : > { %v1633_v5 = vperm.slane %v1561_v55, %v3270_v19 }
 0x3f5   : > { %v1555_v56 = vpop.xlane.xlu2 %1554 }
 0x3f6   : > { %v1631_v0 = vperm.slane %v1555_v56, %v3270_v19  ;;  %v1558_v1 = vpop.xlane.xlu1 %1557 }
 0x3f7   : > { %v1570_v39 = vpop.xlane.xlu0 %1569  ;;  %v1632_v2 = vperm.slane %v1558_v1, %v3270_v19 }
 0x3f8   : > { %v1659_v61 = vsel %vm1304_vm8, %v1631_v0, %v1630_v38  ;;  %v1636_v53 = vperm.slane %v1570_v39, %v3270_v19  ;;  %v1327_v39 = vsel %vm1308_vm10, %v1291_v60, %v1326_v45 }
 0x3f9   : > { %v1660_v6 = vsel %vm1306_vm9, %v1632_v2, %v1659_v61  ;;  %v1292_v2 = vperm.slane %v3418_v51, %v3270_v19 }
 0x3fa   : > { %v1661_v12 = vsel %vm1308_vm10, %v1633_v5, %v1660_v6 }
 0x3fd   : > { %v1564_v63 = vpop.xlane.xlu2 %1563 }
 0x3fe   : > { %v1634_v7 = vperm.slane %v1564_v63, %v3270_v19  ;;  %v1567_v8 = vpop.xlane.xlu1 %1566  ;;  %v1328_v63 = vsel %vm1310_vm11, %v1292_v2, %v1327_v39 }
 0x3ff   : > { %v1216_v9 = vpop.xlane.xlu0 %1215  ;;  %v1635_v14 = vperm.slane %v1567_v8, %v3270_v19 }
 0x400   : > { %v1662_v15 = vsel %vm1310_vm11, %v1634_v7, %v1661_v12  ;;  %v1296_v36 = vperm.slane %v1216_v9, %v3270_v19  ;;  %v1293_v9 = vperm.slane %v3407_v32, %v3270_v19 }
 0x401   : > { %v1663_v28 = vsel %vm1312_vm12, %v1635_v14, %v1662_v15 }
 0x402   : > { %v1664_v3 = vsel %vm1314_vm13, %v1636_v53, %v1663_v28  ;;  %v1329_v28 = vsel %vm1312_vm12, %v1293_v9, %v1328_v63  ;;  %v2609_v9 = vmov 65  }
 0x403   : > { %2360 = vset.pattern.permute.xlu1 %v2609_v9  ;;  %2362 = vset.pattern.permute.xlu2 %v2609_v9 }
 0x405   : > { %v1573_v13 = vpop.xlane.xlu2 %1572 }
 0x406   : > { %v1637_v37 = vperm.slane %v1573_v13, %v3270_v19  ;;  %v1225_v17 = vpop.xlane.xlu1 %1224 }
 0x407   : > { %v1222_v21 = vpop.xlane.xlu0 %1221  ;;  %v1299_v47 = vperm.slane %v1225_v17, %v3270_v19 }
 0x408   : > { %v1665_v20 = vsel %vm1316_vm14, %v1637_v37, %v1664_v3  ;;  %v1298_v30 = vperm.slane %v1222_v21, %v3270_v19 }
 0x409   : > { %v3441_v24 = vsel %vm1013_vm4, %v1665_v20, -1e+30 }
 0x40a   : > { %v1683_v25 = vsel %vm1347_vm0, %v3441_v24, -inf }
 0x40b   : > { %1684 = vmax.xlane.f32.xlu2 %v1683_v25 }
 0x40d   : > { %v1219_v26 = vpop.xlane.xlu2 %1218 }
 0x40e   : > { %v1297_v59 = vperm.slane %v1219_v26, %v3270_v19  ;;  %v1231_v27 = vpop.xlane.xlu1 %1230 }
 0x40f   : > { %v1234_v23 = vpop.xlane.xlu0 %1233  ;;  %v1301_v46 = vperm.slane %v1231_v27, %v3270_v19 }
 0x410   : > { %v1332_v57 = vsel %vm1304_vm8, %v1297_v59, %v1296_v36  ;;  %v1302_v11 = vperm.slane %v1234_v23, %v3270_v19  ;;  %v2403_v36 = vld [vmem:[%s3610_s10 + $0x1] ss:$0 sm:$0xff] }
 0x411   : > { %v1333_v49 = vsel %vm1306_vm9, %v1298_v30, %v1332_v57  ;;  %v1706_v23 = vmul.f32 %v2403_v36, %v2835_v54  ;;  %v1707_v10 = vmul.f32 %v2403_v36, %v2844_v58 }
 0x412   : > { %v1334_v44 = vsel %vm1308_vm10, %v1299_v47, %v1333_v49  ;;  %v1379_v47 = vmul.f32 %v2404_v40, %v2826_v50 }
 0x415   : > { %v1228_v22 = vpop.xlane.xlu2 %1227 }
 0x416   : > { %v1300_v42 = vperm.slane %v1228_v22, %v3270_v19  ;;  %v1210_v52 = vpop.xlane.xlu1 %1209 }
 0x417   : > { %v1237_v55 = vpop.xlane.xlu0 %1236  ;;  %v1294_v5 = vperm.slane %v1210_v52, %v3270_v19 }
 0x418   : > { %v1335_v56 = vsel %vm1310_vm11, %v1300_v42, %v1334_v44  ;;  %v1303_v0 = vperm.slane %v1237_v55, %v3270_v19 }
 0x419   : > { %v1336_v1 = vsel %vm1312_vm12, %v1301_v46, %v1335_v56  ;;  %v1330_v13 = vsel %vm1314_vm13, %v1294_v5, %v1329_v28 }
 0x41a   : > { %v1337_v38 = vsel %vm1314_vm13, %v1302_v11, %v1336_v1 }
 0x41b   : > { %v1338_v61 = vsel %vm1316_vm14, %v1303_v0, %v1337_v38 }
 0x41c   : > { %v3471_v6 = vsel %vm1013_vm4, %v1338_v61, -1e+30 }
 0x41d   : > { %v1165_v7 = vpop.xlane.xlu2 %1164  ;;  %v1357_v8 = vsel %vm1347_vm0, %v3471_v6, -inf }
 0x41e   : > { %v1279_v12 = vperm.slane %v1165_v7, %v3270_v19  ;;  %1358 = vmax.xlane.f32.xlu0 %v1357_v8 }
 0x41f   : > { %v1213_v51 = vpop.xlane.xlu0 %1212 }
 0x420   : > { %v1295_v14 = vperm.slane %v1213_v51, %v3270_v19  ;;  %v1317_v15 = vsel %vm1316_vm14, %v1279_v12, %v3346_v33  ;;  %v2610_v12 = vmov 64  }
 0x421   : > { %v1343_v53 = vsel %vm1010_vm15, %v1317_v15, -1e+30  ;;  %2359 = vset.pattern.permute.xlu0 %v2610_v12 }
 0x422   : > { %v1348_v37 = vsel %vm1347_vm0, %v1343_v53, -inf  ;;  %v1331_v32 = vsel %vm1316_vm14, %v1295_v14, %v1330_v13 }
 0x423   : > { %1349 = vmax.xlane.f32.xlu2 %v1348_v37  ;;  %v1345_v17 = vsel %vm1012_vm1, %v1331_v32, -1e+30 }
 0x424   : > { %v1354_v19 = vsel %vm1347_vm0, %v1345_v17, -inf }
 0x425   : > { %1355 = vmax.xlane.f32.xlu1 %v1354_v19  ;;  %v1676_v21 = vpop.xlane.xlu2 %1675 }
 0x426   : > { %v1686_v33 = vsub.f32 %v3341_v43, %v1676_v21 }
 0x428   : > { %v1690_v3 = vmul.f32 1.442695, %v1686_v33 }
 0x42a   : > { %2379 = vpow2.f32 %v1690_v3 }
 0x430   : > { %v2380_v20 = vpop.eup %2379  ;;  %v1679_v25 = vpop.xlane.xlu1 %1678 }
 0x431   : > { %v1687_v26 = vsub.f32 %v3366_v48, %v1679_v25  ;;  %v1698_v59 = vmul.f32 %v2380_v20, %v3320_v4 }
 0x433   : > { %v1692_v27 = vmul.f32 1.442695, %v1687_v26  ;;  %2257 = vmatmul.msk.f32.vlgmr.msrb.gmra.mxu3 %vm1347_vm0, %v1698_v59 }
 0x434   : > { %1772 = vmatpush.msrb.mxu3 %v1706_v23 }
 0x435   : > { %2381 = vpow2.f32 %v1692_v27 }
 0x43b   : > { %v2382_v43 = vpop.eup %2381 }
 0x43c   : > { %v1699_v57 = vmul.f32 %v2382_v43, %v3356_v34 }
 0x43e   : > { %2258 = vmatmul.msk.f32.vlgmr.msra.gmra.mxu3 %vm1347_vm0, %v1699_v57 }
 0x43f   : > { %1795 = vmatpush.msra.mxu3 %v1707_v10 }
 0x441   : > { %v1353_v58 = vpop.xlane.xlu1 %1352 }
 0x457   : > { %v1682_v48 = vpop.xlane.xlu0 %1681 }
 0x458   : > { %v1688_v30 = vsub.f32 %v3414_v41, %v1682_v48  ;;  %v1361_v41 = vsub.f32 %v3387_v62, %v1353_v58 }
 0x45a   : > { %v1694_v31 = vmul.f32 1.442695, %v1688_v30  ;;  %v1366_v42 = vmul.f32 1.442695, %v1361_v41 }
 0x45c   : > { %2383 = vpow2.f32 %v1694_v31 }
 0x462   : > { %v2384_v49 = vpop.eup %2383 }
 0x463   : > { %v1700_v54 = vmul.f32 %v2384_v49, %v3402_v16  ;;  %v1986_v49 = vshrl.u32 %v1270_v29, 7 }
 0x465   : > { %2259 = vmatmul.msk.f32.vlgmr.msrb.gmra.mxu3 %vm1347_vm0, %v1700_v54  ;;  %v576_v54 = vld [vmem:[%s567_s15] sm:$0xf]  ;;  %s553_s15 = scalar_lea.vmem [#allocation10], %s2238_s19 }
 0x466   : > { %1841 = vmatpush.msrb.mxu3 %v1379_v47  ;;  %v1991_v40 = vperm.slane %v576_v54, 1  ;;  %v1984_v47 = vperm.slane %v576_v54, 0  ;;  %v2005_v58 = vperm.slane %v576_v54, 3  ;;  %s2099_s3 = sshll.u32 %s553_s15, 4  ;;  %s2100_s3 = int_to_ptr.vmem [resolvable:$true] %s2099_s3 }
 0x47e   : > { %v1685_v22 = vpop.xlane.xlu2 %1684 }
 0x47f   : > { %v1689_v35 = vsub.f32 %v3441_v24, %v1685_v22  ;;  %v1998_v22 = vperm.slane %v576_v54, 2 }
 0x481   : > { %v1696_v60 = vmul.f32 1.442695, %v1689_v35 }
 0x483   : > { %2385 = vpow2.f32 %v1696_v60 }
 0x484   : > { %2387 = vpow2.f32 %v1366_v42  ;;  %v2375_v42 = vld [vmem:[%s3611_s11 + $0x1] ss:$0 sm:$0xff] }
 0x489   : > { %v2386_v46 = vpop.eup %2385 }
 0x48a   : > { %v1701_v44 = vmul.f32 %v2386_v46, %v3431_v18  ;;  %v2388_v55 = vpop.eup %2387  ;;  %v2376_v46 = vld [vmem:[%s3611_s11] ss:$0 sm:$0xff] }
 0x48b   : > { %v1373_v11 = vmul.f32 %v2388_v55, %v3356_v34 }
 0x48c   : > { %2260 = vmatmul.msk.f32.vlgmr.msra.gmra.mxu3 %vm1347_vm0, %v1701_v44 }
 0x491   : > { %v1359_v50 = vpop.xlane.xlu0 %1358 }
 0x492   : > { %v1363_v56 = vsub.f32 %v3471_v6, %v1359_v50 }
 0x494   : > { %v1370_v45 = vmul.f32 1.442695, %v1363_v56  ;;  %2262 = vmatmul.msk.f32.vlgmr.msrb.gmra.mxu3 %vm1347_vm0, %v1373_v11 }
 0x496   : > { %2389 = vpow2.f32 %v1370_v45  ;;  %v1350_v62 = vpop.xlane.xlu2 %1349 }
 0x497   : > { %v1360_v24 = vsub.f32 %v1343_v53, %v1350_v62 }
 0x498   : > { %v1356_v0 = vpop.xlane.xlu1 %1355 }
 0x499   : > { %v1364_v1 = vmul.f32 1.442695, %v1360_v24  ;;  %v1362_v39 = vsub.f32 %v1345_v17, %v1356_v0 }
 0x49b   : > { %2391 = vpow2.f32 %v1364_v1  ;;  %v1368_v52 = vmul.f32 1.442695, %v1362_v39  ;;  %v2377_v1 = vld [vmem:[%s3608_s8] ss:$0 sm:$0xff] }
 0x49c   : > { %v2390_v38 = vpop.eup %2389 }
 0x49d   : > { %2393 = vpow2.f32 %v1368_v52  ;;  %v1375_v2 = vmul.f32 %v2390_v38, %v3431_v18 }
 0x49f   : > { %2264 = vmatmul.msk.f32.vlgmr.msrb.gmra.mxu2 %vm1347_vm0, %v1375_v2 }
 0x4a1   : > { %v2392_v34 = vpop.eup %2391 }
 0x4a2   : > { %v1372_v61 = vmul.f32 %v2392_v34, %v3320_v4 }
 0x4a3   : > { %v2394_v6 = vpop.eup %2393 }
 0x4a4   : > { %2261 = vmatmul.msk.f32.vlgmr.msrb.gmra.mxu0 %vm1347_vm0, %v1372_v61  ;;  %v1374_v63 = vmul.f32 %v2394_v6, %v3402_v16 }
 0x4a6   : > { %2263 = vmatmul.msk.f32.vlgmr.msrb.gmra.mxu1 %vm1347_vm0, %v1374_v63 }
 0x4b6   : > { %v1728_v5 = vpop.f32.mrf.mxu3 }
 0x4c1   : > { %v1751_v7 = vpop.f32.mrf.mxu3 }
 0x4e8   : > { %v1774_v8 = vpop.f32.mrf.mxu3 }
 0x50f   : > { %v1797_v18 = vpop.f32.mrf.mxu3 }
 0x517   : > { %v1843_v51 = vpop.f32.mrf.mxu3 }
 0x518   : > { %v3525_v28 = vadd.f32 %v1843_v51, %v1751_v7 }
 0x51a   : > { %v1893_v19 = vmax.f32 %v3525_v28, 1e-30 }
 0x521   : > { %v1820_v14 = vpop.f32.mrf.mxu0 }
 0x522   : > { %v3523_v15 = vadd.f32 %v1820_v14, %v1728_v5  ;;  %v1889_v4 = vpop.f32.mrf.mxu2 }
 0x523   : > { %v1866_v53 = vpop.f32.mrf.mxu1  ;;  %v3527_v16 = vadd.f32 %v1889_v4, %v1797_v18  ;;  %v2049_v4 = vld [vmem:[#allocation8 + $0x28] sm:$0xff] }
 0x524   : > { %v1892_v13 = vmax.f32 %v3523_v15, 1e-30  ;;  %v3530_v37 = vadd.f32 %v1866_v53, %v1774_v8 }
 0x525   : > { %v1895_v32 = vmax.f32 %v3527_v16, 1e-30 }
 0x526   : > { %2395 = vrcp.f32 %v1892_v13  ;;  %v1894_v17 = vmax.f32 %v3530_v37, 1e-30 }
 0x528   : > { %2397 = vrcp.f32 %v1894_v17 }
 0x529   : > { %2399 = vrcp.f32 %v1895_v32 }
 0x52a   : > { %2401 = vrcp.f32 %v1893_v19 }
 0x52c   : > { %v2396_v21 = vpop.eup %2395 }
 0x52d   : > { %v1900_v33 = vmul.f32 %v2396_v21, %v3523_v15 }
 0x52e   : > { %v2398_v3 = vpop.eup %2397 }
 0x52f   : > { %v2400_v20 = vpop.eup %2399  ;;  %v1904_v25 = vsub.f32 2.0, %v1900_v33  ;;  %v1902_v26 = vmul.f32 %v2398_v3, %v3530_v37 }
 0x530   : > { %v2402_v59 = vpop.eup %2401  ;;  %v1903_v27 = vmul.f32 %v2400_v20, %v3527_v16 }
 0x531   : > { %v1906_v36 = vsub.f32 2.0, %v1902_v26  ;;  %v1908_v23 = vmul.f32 %v2396_v21, %v1904_v25  ;;  %v1901_v57 = vmul.f32 %v2402_v59, %v3525_v28  ;;  %v2047_v21 = vld [vmem:[#allocation8 + $0x18] sm:$0xff] }
 0x532   : > { %v1907_v10 = vsub.f32 2.0, %v1903_v27 }
 0x533   : > { %1944 = vperm.xlu1 %2360, %v1908_v23   ;;  %1915 = vperm.xlu0 %2359, %v1908_v23   ;;  %v1910_v43 = vmul.f32 %v2398_v3, %v1906_v36  ;;  %v1905_v48 = vsub.f32 2.0, %v1901_v57 }
 0x534   : > { %v1911_v30 = vmul.f32 %v2400_v20, %v1907_v10 }
 0x535   : > { %1952 = vperm.xlu2 %2362, %v1910_v43   ;;  %v1909_v31 = vmul.f32 %v2402_v59, %v1905_v48  ;;  %v2045_v59 = vld [vmem:[#allocation8 + $0x8] sm:$0xff] }
 0x53b   : > { %2361 = vset.pattern.permute.xlu1 %v2610_v12  ;;  %2365 = vset.pattern.permute.xlu0 %v2609_v9 }
 0x53c   : > { %1925 = vperm.xlu1 %2361, %v1910_v43   ;;  %1956 = vperm.xlu0 %2365, %v1911_v30   ;;  %v2044_v43 = vld [vmem:[#allocation8] sm:$0xff] }
 0x53d   : > { %2363 = vset.pattern.permute.xlu2 %v2610_v12  ;;  %v2050_v12 = vld [vmem:[#allocation8 + $0x30] sm:$0xff] }
 0x53e   : > { %1920 = vperm.xlu2 %2363, %v1909_v31  }
 0x544   : > { %1930 = vperm.xlu1 %2361, %v1911_v30   ;;  %2368 = vset.pattern.permute.xlu0 %v1986_v49 }
 0x546   : > { %2364 = vset.pattern.permute.xlu2 %v2609_v9  ;;  %v2051_v9 = vld [vmem:[#allocation8 + $0x38] sm:$0xff] }
 0x547   : > { %1948 = vperm.xlu2 %2364, %v1909_v31   ;;  %2073 = vmatpush.msra.mxu0 %v2051_v9 }
 0x549   : > { %2074 = vmatpush.msra.mxu0 %v2050_v12 }
 0x54b   : > { %2075 = vmatpush.msra.mxu0 %v2049_v4 }
 0x54c   : > { %2367 = vset.pattern.permute.xlu1 %v1986_v49 }
 0x54f   : > { %2366 = vset.pattern.permute.xlu2 %v1986_v49 }
 0x554   : > { %1996 = vperm.xlu1 %2367, %v1991_v40  }
 0x557   : > { %1989 = vperm.xlu2 %2366, %v1984_v47  }
 0x55c   : > { %2010 = vperm.xlu1 %2367, %v2005_v58  }
 0x55f   : > { %2003 = vperm.xlu2 %2366, %v1998_v22  }
 0x58f   : > { %v1953_v29 = vpop.permute.xlu2 %1952 }
 0x590   : > { %v1962_v45 = vmul.f32 %v2375_v42, %v1953_v29 }
 0x598   : > { %v1921_v35 = vpop.permute.xlu2 %1920 }
 0x599   : > { %v1935_v34 = vmul.f32 %v2376_v46, %v1921_v35 }
 0x5a1   : > { %v1949_v50 = vpop.permute.xlu2 %1948 }
 0x5a2   : > { %v1961_v38 = vmul.f32 %v2375_v42, %v1949_v50 }
 0x5a4   : > { %v1965_v6 = vadd.f32 %v1961_v38, %v1935_v34  ;;  %v2378_v38 = vld [vmem:[%s3640_s18] ss:$0 sm:$0xff] }
 0x5a5   : > { %v1945_v41 = vpop.permute.xlu1 %1944  ;;  %v1916_v60 = vpop.permute.xlu0 %1915 }
 0x5a6   : > { %v1960_v44 = vmul.f32 %v2375_v42, %v1945_v41  ;;  %v1934_v55 = vmul.f32 %v2376_v46, %v1916_v60  ;;  %v1969_v18 = vmul.f32 %v1965_v6, %v3525_v28  ;;  %v2046_v28 = vld [vmem:[#allocation8 + $0x10] sm:$0xff] }
 0x5a8   : > { %v1964_v11 = vadd.f32 %v1960_v44, %v1934_v55  ;;  %v1977_v19 = vadd.f32 %v2377_v1, %v1969_v18 }
 0x5aa   : > { %v1968_v24 = vmul.f32 %v1964_v11, %v3523_v15  ;;  %v1981_v25 = vmax.f32 %v1977_v19, 0.0 }
 0x5ac   : > { %v1976_v2 = vadd.f32 %v2377_v1, %v1968_v24 }
 0x5ae   : > { %v1926_v56 = vpop.permute.xlu1 %1925  ;;  %v1980_v63 = vmax.f32 %v1976_v2, 0.0  ;;  %v1957_v7 = vpop.permute.xlu0 %1956 }
 0x5af   : > { %v1936_v62 = vmul.f32 %v2376_v46, %v1926_v56  ;;  %v1963_v53 = vmul.f32 %v2375_v42, %v1957_v7 }
 0x5b1   : > { %v1966_v0 = vadd.f32 %v1962_v45, %v1936_v62  ;;  %v1990_v39 = vpop.permute.xlu2 %1989 }
 0x5b2   : > { %v2012_v51 = vmul.f32 %v1990_v39, %v1980_v63 }
 0x5b3   : > { %v1970_v52 = vmul.f32 %v1966_v0, %v3530_v37  ;;  %v2048_v37 = vld [vmem:[#allocation8 + $0x20] sm:$0xff] }
 0x5b4   : > { %v2016_v32 = vsel %vm731_vm3, %v2012_v51, 0.0  ;;  %2076 = vmatpush.msra.mxu0 %v2048_v37 }
 0x5b5   : > { %v1978_v61 = vadd.f32 %v2377_v1, %v1970_v52  ;;  %v2017_v33 = vrot.slane %v2016_v32, 4 }
 0x5b6   : > { %v1931_v5 = vpop.permute.xlu1 %1930  ;;  %2077 = vmatpush.msra.mxu0 %v2047_v21 }
 0x5b7   : > { %v1982_v8 = vmax.f32 %v1978_v61, 0.0  ;;  %v1937_v14 = vmul.f32 %v2376_v46, %v1931_v5  ;;  %v2018_v27 = vadd.f32 %v2017_v33, %v2016_v32 }
 0x5b8   : > { %2078 = vmatpush.msra.mxu0 %v2046_v28 }
 0x5b9   : > { %v2004_v15 = vpop.permute.xlu2 %2003  ;;  %v1967_v17 = vadd.f32 %v1963_v53, %v1937_v14  ;;  %v2019_v31 = vrot.slane %v2018_v27, 2 }
 0x5ba   : > { %v2014_v13 = vmul.f32 %v2004_v15, %v1982_v8  ;;  %2079 = vmatpush.msra.mxu0 %v2045_v59 }
 0x5bb   : > { %v1971_v20 = vmul.f32 %v1967_v17, %v3527_v16  ;;  %v2020_v22 = vadd.f32 %v2019_v31, %v2018_v27 }
 0x5bc   : > { %v2030_v3 = vsel %vm731_vm3, %v2014_v13, 0.0  ;;  %2080 = vmatpush.msra.mxu0 %v2044_v43 }
 0x5bd   : > { %v2031_v36 = vrot.slane %v2030_v3, 4  ;;  %v1979_v10 = vadd.f32 %v2377_v1, %v1971_v20  ;;  %v2021_v46 = vrot.slane %v2020_v22, 1 }
 0x5bf   : > { %v2032_v30 = vadd.f32 %v2031_v36, %v2030_v3  ;;  %v1983_v54 = vmax.f32 %v1979_v10, 0.0  ;;  %v2022_v56 = vadd.f32 %v2021_v46, %v2020_v22 }
 0x5c1   : > { %v2033_v47 = vrot.slane %v2032_v30, 2 }
 0x5c3   : > { %v2034_v42 = vadd.f32 %v2033_v47, %v2032_v30 }
 0x5c5   : > { %v2035_v11 = vrot.slane %v2034_v42, 1 }
 0x5c6   : > { %v1997_v26 = vpop.permute.xlu1 %1996 }
 0x5c7   : > { %v2013_v23 = vmul.f32 %v1997_v26, %v1981_v25  ;;  %v2036_v0 = vadd.f32 %v2035_v11, %v2034_v42 }
 0x5c9   : > { %v2023_v57 = vsel %vm731_vm3, %v2013_v23, 0.0 }
 0x5ca   : > { %v2024_v48 = vrot.slane %v2023_v57, 4 }
 0x5cc   : > { %v2025_v49 = vadd.f32 %v2024_v48, %v2023_v57 }
 0x5ce   : > { %v2026_v16 = vrot.slane %v2025_v49, 2  ;;  %v2011_v40 = vpop.permute.xlu1 %2010 }
 0x5cf   : > { %v2015_v58 = vmul.f32 %v2011_v40, %v1983_v54 }
 0x5d0   : > { %v2027_v29 = vadd.f32 %v2026_v16, %v2025_v49 }
 0x5d1   : > { %v2037_v35 = vsel %vm731_vm3, %v2015_v58, 0.0 }
 0x5d2   : > { %v2028_v41 = vrot.slane %v2027_v29, 1  ;;  %v2038_v60 = vrot.slane %v2037_v35, 4 }
 0x5d4   : > { %v2039_v44 = vadd.f32 %v2038_v60, %v2037_v35  ;;  %v2029_v55 = vadd.f32 %v2028_v41, %v2027_v29 }
 0x5d6   : > { %v2040_v50 = vrot.slane %v2039_v44, 2  ;;  %v2060_v24 = vsel %vm1304_vm8, %v2029_v55, %v2022_v56 }
 0x5d7   : > { %v2061_v39 = vsel %vm1306_vm9, %v2036_v0, %v2060_v24 }
 0x5d8   : > { %v2041_v45 = vadd.f32 %v2040_v50, %v2039_v44 }
 0x5da   : > { %v2042_v62 = vrot.slane %v2041_v45, 1 }
 0x5dc   : > { %v2043_v1 = vadd.f32 %v2042_v62, %v2041_v45 }
 0x5de   : > { %v2062_v52 = vsel %vm1308_vm10, %v2043_v1, %v2061_v39 }
 0x5df   : > { %2265 = vmatmul.msk.f32.vlgmr.msra.gmra.mxu0 %vm731_vm3, %v2062_v52 }
 0x65c   : > { %v2082_v2 = vpop.f32.mrf.mxu0 }
 0x65d   : > { %v2083_v34 = vadd.f32 %v2378_v38, %v2082_v2 }
 0x65f   : > { %2085 = vst [vmem:[%s553_s15] sm:$0xf] %v2083_v34 }
 0x660   : > { %2552 = shalt.err (!%p2549_p8)
}
 0x661   : > { %2289 = dma.vmem_to_hbm [thread:$0]  (%p2724_p5), %s2100_s3, 64, %s2102_s22, %s2087_s28  }
 0x662 PF: > { %s3641_s16 = sld [smem:[#allocation17_spill]] }
 0x663   : > { %s3642_s24 = sld [smem:[#allocation15_spill]] }
 0x668   : > { %p2316_p9 = scmp.ge.s32.totalorder %s3641_s16, 2 }
 0x669   : > { %s2113_s26 = sand.u32 1, %s3642_s24  }
 0x66a   : > { %p2305_p10 = pnand %p2316_p9, %p2728_p6  ;;  %s2114_s27 = scalar_lea.sflag [#allocation4], %s2113_s26 }
 0x66c   : > { %p2306_p11 = pneg %p2305_p10 }
 0x66e   : > { %2582 = dma.done.wait (%p2306_p11), %s2114_s27, 64  }
 0x66f   : > { %2584 = vsyncadd (%p2306_p11), %s2114_s27, 4294967232  ;;  %s3644_s16 = sld [smem:[#allocation18_spill]]  ;;  %s3647_s29 = smov %s2591_s30 }
 0x670   : > { %s3645_s18 = sld [smem:[#allocation16_spill]] }
 0x671   : > { %s3646_s15 = sld [smem:[#allocation19_spill]] }
 0x675   : > { %p27_p12 = scmp.ge.s32.totalorder %s3644_s16, 4  }
 0x676   : > { %s3648_s30 = smov %s3645_s18 }
 0x677   :  { %29 = sbr.rel (!%p27_p12) target bundleno = 10 (0xa), region = 134 }
 0x67c   :  { %2120 = vsyncpa [#allocation3], 1 }
 0x67d   :  { %2122 = vsyncpa [#allocation3 + $0x1], 1 }
 0x67e   :  { %2123 = vsyncpa [#allocation6], 1 }
 0x67f   :  { %2124 = vsyncpa [#allocation9], 1 }
 0x680   :  { %2125 = vsyncpa [#allocation4], 1 }
 0x681   :  { %2127 = vsyncpa [#allocation4 + $0x1], 1 }

</bundles_post_ra>
